<compile_context>
chip_gen: v6e
topology: v6e:2x2x1
jax: 0.10.0
libtpu: 0.0.40
codegen_flags: <defaults>
</compile_context>

<pallas_src>
import functools

import jax
import jax.numpy as jnp
from jax.experimental import pallas as pl
from jax.experimental.pallas import tpu as pltpu

# ---------------- config (small synthetic encoder standing in for AutoModel) ----------
VOCAB = 100
B = 2
S = 8
H = 32
NUM_HEADS = 4
DH = H // NUM_HEADS
FFN = 64
NUM_LAYERS = 2
LN_EPS = 1e-12
ATTN_SCALE = 1.0 / float(DH) ** 0.5


def _gelu(x):
    # tanh approximation of GELU (EUP-friendly), kept in f32
    return 0.5 * x * (1.0 + jnp.tanh(0.7978845608028654 * (x + 0.044715 * x * x * x)))


def _layernorm(x, g, b):
    mu = jnp.mean(x, axis=-1, keepdims=True)
    var = jnp.mean((x - mu) ** 2, axis=-1, keepdims=True)
    return (x - mu) * jax.lax.rsqrt(var + LN_EPS) * g + b


# ---------------------------- fused per-example kernel ----------------------------------
def _encoder_kernel(n_layers, n_heads,
                    h0_ref, mask_ref,
                    wqkv_ref, bqkv_ref, wo_ref, bo_ref, ln1g_ref, ln1b_ref,
                    w1_ref, b1_ref, w2_ref, b2_ref, ln2g_ref, ln2b_ref,
                    o_ref):
    h = h0_ref[0]                       # (S, H) f32 embeddings for this example
    mask = mask_ref[0]                  # (1, S) f32 key-validity mask
    neg_bias = (mask - 1.0) * 1e9       # 0 for valid keys / -1e9 for padding (hoisted)

    s, hd = h.shape
    dh = hd // n_heads

    # Static unroll over layers (all weights VMEM-resident, ~50 KB). For a real
    # many-layer model: lax.fori_loop + per-layer weight streaming (pl.Buffered).
    for l in range(n_layers):
        hb = h.astype(jnp.bfloat16)

        # ---- fused QKV projection: ONE MXU push instead of 3*NH tiny ones -------------
        qkv = jnp.dot(hb, wqkv_ref[l], preferred_element_type=jnp.float32) + bqkv_ref[l]
        qkv_b = qkv.astype(jnp.bfloat16)            # per-head slices below are cheap
                                                    # in-vreg lane selects (3H=96 <= 128)

        # ---- per-head q@k^T (contract last dims, no transpose); scores of all heads
        #      stacked along sublanes so the softmax is ONE max/exp/sum/reciprocal ------
        sc = jnp.concatenate([
            jax.lax.dot_general(
                qkv_b[:, hh * dh:(hh + 1) * dh],                 # q_h (scale pre-folded)
                qkv_b[:, hd + hh * dh: hd + (hh + 1) * dh],      # k_h
                dimension_numbers=(((1,), (1,)), ((), ())),
                preferred_element_type=jnp.float32)
            for hh in range(n_heads)], axis=0)                   # (NH*S, S) f32
        sc = sc + neg_bias
        sc = sc - jnp.max(sc, axis=-1, keepdims=True)
        p = jnp.exp(sc)
        p = p * pl.reciprocal(jnp.sum(p, axis=-1, keepdims=True), approx=True)

        # ---- per-head context, lane-concatenated into one (S, H) slab, then a single
        #      output projection against the full (H, H) W_o (no serial add chain) ------
        ctx = jnp.concatenate([
            jnp.dot(p[hh * s:(hh + 1) * s, :].astype(jnp.bfloat16),
                    qkv_b[:, 2 * hd + hh * dh: 2 * hd + (hh + 1) * dh],
                    preferred_element_type=jnp.float32)
            for hh in range(n_heads)], axis=-1)                  # (S, H) f32
        attn = jnp.dot(ctx.astype(jnp.bfloat16), wo_ref[l],
                       preferred_element_type=jnp.float32) + bo_ref[l]

        h1 = _layernorm(h + attn, ln1g_ref[l], ln1b_ref[l])

        # ---- feed-forward ---------------------------------------------------------------
        ff = jnp.dot(h1.astype(jnp.bfloat16), w1_ref[l],
                     preferred_element_type=jnp.float32) + b1_ref[l]
        ff = _gelu(ff)                                           # f32 (v5e-safe)
        ff = jnp.dot(ff.astype(jnp.bfloat16), w2_ref[l],
                     preferred_element_type=jnp.float32) + b2_ref[l]
        h = _layernorm(h1 + ff, ln2g_ref[l], ln2b_ref[l])

    # ---- masked mean pooling (exact division per review correctness item) --------------
    pooled = jnp.dot(mask, h, preferred_element_type=jnp.float32)        # (1, H)
    denom = jnp.maximum(jnp.sum(mask, axis=-1, keepdims=True), 1e-9)     # (1, 1)
    o_ref[0] = pooled / denom


# ---------------------------- wrapper ----------------------------------------------------
def biencoder_forward(packed, input_ids, attention_mask):
    Bn, Sn = input_ids.shape
    Ln = packed['ln1_g'].shape[0]
    Hn = packed['ln1_g'].shape[-1]
    ffn_dim = packed['w1'].shape[-1]
    n_heads = NUM_HEADS

    # Embedding gather + positional add in the XLA wrapper: keeps the (vocab, H) table
    # HBM-resident (no one-hot matmul, no vocab-sized VMEM operand).
    h0 = (jnp.take(packed['word_emb'], input_ids, axis=0)
          + packed['pos_emb'][None, :, :]).astype(jnp.float32)           # (B, S, H)
    mask3 = attention_mask.astype(jnp.float32).reshape(Bn, 1, Sn)        # (B, 1, S)

    weights = (packed['wqkv'], packed['bqkv'], packed['wo'], packed['bo'],
               packed['ln1_g'], packed['ln1_b'],
               packed['w1'], packed['b1'], packed['w2'], packed['b2'],
               packed['ln2_g'], packed['ln2_b'])

    def const_spec(a):  # whole-array block, same index every step -> stays VMEM-resident
        nd = a.ndim
        return pl.BlockSpec(a.shape, lambda b, _nd=nd: (0,) * _nd)

    in_specs = ([pl.BlockSpec((1, Sn, Hn), lambda b: (b, 0, 0)),
                 pl.BlockSpec((1, 1, Sn), lambda b: (b, 0, 0))]
                + [const_spec(w) for w in weights])
    out_spec = pl.BlockSpec((1, 1, Hn), lambda b: (b, 0, 0))

    # advisory cost estimate so XLA can schedule around the custom call
    flops = int(Bn * (Ln * (2 * Sn * Hn * 3 * Hn + 4 * Sn * Sn * Hn
                            + 2 * Sn * Hn * Hn + 4 * Sn * Hn * ffn_dim)
                      + 2 * Sn * Hn))
    transcendentals = int(Bn * Ln * (n_heads * Sn * Sn + Sn * ffn_dim + 4 * Sn))
    bytes_accessed = int(h0.size * 4 + mask3.size * 4
                         + sum(w.size * w.dtype.itemsize for w in weights)
                         + Bn * Hn * 4)

    kernel = functools.partial(_encoder_kernel, Ln, n_heads)

    out = pl.pallas_call(
        kernel,
        out_shape=jax.ShapeDtypeStruct((Bn, 1, Hn), jnp.float32),
        grid=(Bn,),
        in_specs=in_specs,
        out_specs=out_spec,
        compiler_params=pltpu.CompilerParams(
            dimension_semantics=("parallel",),
            vmem_limit_bytes=32 * 1024 * 1024),
        cost_estimate=pl.CostEstimate(flops=flops,
                                      transcendentals=transcendentals,
                                      bytes_accessed=bytes_accessed),
    )(h0, mask3, *weights)
    return out.reshape(Bn, Hn)


# ---------------------------- parameter init / packing ----------------------------------
def init_params(key):
    def nrm(k, shape, std=0.02):
        return std * jax.random.normal(k, shape, dtype=jnp.float32)

    keys = iter(jax.random.split(key, 2 + NUM_LAYERS * 6))
    params = {
        'word_emb': nrm(next(keys), (VOCAB, H)),
        'pos_emb': nrm(next(keys), (S, H)),
        'layers': [],
    }
    for _ in range(NUM_LAYERS):
        lp = {
            'wq': nrm(next(keys), (H, H)), 'bq': jnp.zeros((1, H), jnp.float32),
            'wk': nrm(next(keys), (H, H)), 'bk': jnp.zeros((1, H), jnp.float32),
            'wv': nrm(next(keys), (H, H)), 'bv': jnp.zeros((1, H), jnp.float32),
            'wo': nrm(next(keys), (H, H)), 'bo': jnp.zeros((1, H), jnp.float32),
            'ln1_g': jnp.ones((1, H), jnp.float32), 'ln1_b': jnp.zeros((1, H), jnp.float32),
            'w1': nrm(next(keys), (H, FFN)), 'b1': jnp.zeros((1, FFN), jnp.float32),
            'w2': nrm(next(keys), (FFN, H)), 'b2': jnp.zeros((1, H), jnp.float32),
            'ln2_g': jnp.ones((1, H), jnp.float32), 'ln2_b': jnp.zeros((1, H), jnp.float32),
        }
        params['layers'].append(lp)
    return params


def pack_params(params):
    """Stack per-layer weights, fuse Q/K/V into a single (H, 3H) projection, and fold the
    1/sqrt(DH) attention scale into the Q weights/bias (all done once, outside the kernel).
    Matmul weights are stored in bf16 (MXU inputs); biases / LayerNorm params stay f32."""

    def stack(name):
        return jnp.stack([lp[name] for lp in params['layers']], axis=0)

    wqkv = jnp.concatenate([stack('wq') * ATTN_SCALE, stack('wk'), stack('wv')], axis=-1)
    bqkv = jnp.concatenate([stack('bq') * ATTN_SCALE, stack('bk'), stack('bv')], axis=-1)

    return {
        'word_emb': params['word_emb'],                     # (V, H) f32, gathered in wrapper
        'pos_emb': params['pos_emb'],                       # (S, H) f32
        'wqkv': wqkv.astype(jnp.bfloat16),                  # (L, H, 3H)
        'bqkv': bqkv,                                       # (L, 1, 3H) f32
        'wo': stack('wo').astype(jnp.bfloat16),             # (L, H, H)
        'bo': stack('bo'),
        'ln1_g': stack('ln1_g'), 'ln1_b': stack('ln1_b'),
        'w1': stack('w1').astype(jnp.bfloat16), 'b1': stack('b1'),
        'w2': stack('w2').astype(jnp.bfloat16), 'b2': stack('b2'),
        'ln2_g': stack('ln2_g'), 'ln2_b': stack('ln2_b'),
    }


if __name__ == "__main__":
    key = jax.random.PRNGKey(0)
    pkey, ikey = jax.random.split(key)
    params = init_params(pkey)
    packed = pack_params(params)

    input_ids = jax.random.randint(ikey, (B, S), 0, VOCAB, dtype=jnp.int32)
    lengths = jnp.array([S, 5], dtype=jnp.int32)
    attention_mask = (jnp.arange(S)[None, :] < lengths[:, None]).astype(jnp.int32)

    fwd = jax.jit(biencoder_forward)
    out = fwd(packed, input_ids, attention_mask)
    jax.block_until_ready(out)
    assert out.shape == (B, H)
    print("KERNEL_OK")
</pallas_src>

<mosaic_0001>
module attributes {stable_mosaic.version = 11 : i64} {
  func.func @_encoder_kernel(%arg0: i32, %arg1: memref<1x8x32xf32, #tpu.memory_space<vmem>>, %arg2: memref<1x1x8xf32, #tpu.memory_space<vmem>>, %arg3: memref<2x32x96xbf16, #tpu.memory_space<vmem>>, %arg4: memref<2x1x96xf32, #tpu.memory_space<vmem>>, %arg5: memref<2x32x32xbf16, #tpu.memory_space<vmem>>, %arg6: memref<2x1x32xf32, #tpu.memory_space<vmem>>, %arg7: memref<2x1x32xf32, #tpu.memory_space<vmem>>, %arg8: memref<2x1x32xf32, #tpu.memory_space<vmem>>, %arg9: memref<2x32x64xbf16, #tpu.memory_space<vmem>>, %arg10: memref<2x1x64xf32, #tpu.memory_space<vmem>>, %arg11: memref<2x64x32xbf16, #tpu.memory_space<vmem>>, %arg12: memref<2x1x32xf32, #tpu.memory_space<vmem>>, %arg13: memref<2x1x32xf32, #tpu.memory_space<vmem>>, %arg14: memref<2x1x32xf32, #tpu.memory_space<vmem>>, %arg15: memref<1x1x32xf32, #tpu.memory_space<vmem>>) attributes {dimension_semantics = [#tpu.dimension_semantics<parallel>], iteration_bounds = array<i64: 2>, scalar_prefetch = 0 : i64, scratch_operands = 0 : i64, tpu.core_type = #tpu.core_type<tc>, window_params = [{transform_indices = @transform_0, window_bounds = array<i64: 1, 8, 32>}, {transform_indices = @transform_1, window_bounds = array<i64: 1, 1, 8>}, {pipeline_mode = #tpu.pipeline_mode<synchronous>, transform_indices = @transform_2, window_bounds = array<i64: 2, 32, 96>}, {pipeline_mode = #tpu.pipeline_mode<synchronous>, transform_indices = @transform_3, window_bounds = array<i64: 2, 1, 96>}, {pipeline_mode = #tpu.pipeline_mode<synchronous>, transform_indices = @transform_4, window_bounds = array<i64: 2, 32, 32>}, {pipeline_mode = #tpu.pipeline_mode<synchronous>, transform_indices = @transform_5, window_bounds = array<i64: 2, 1, 32>}, {pipeline_mode = #tpu.pipeline_mode<synchronous>, transform_indices = @transform_6, window_bounds = array<i64: 2, 1, 32>}, {pipeline_mode = #tpu.pipeline_mode<synchronous>, transform_indices = @transform_7, window_bounds = array<i64: 2, 1, 32>}, {pipeline_mode = #tpu.pipeline_mode<synchronous>, transform_indices = @transform_8, window_bounds = array<i64: 2, 32, 64>}, {pipeline_mode = #tpu.pipeline_mode<synchronous>, transform_indices = @transform_9, window_bounds = array<i64: 2, 1, 64>}, {pipeline_mode = #tpu.pipeline_mode<synchronous>, transform_indices = @transform_10, window_bounds = array<i64: 2, 64, 32>}, {pipeline_mode = #tpu.pipeline_mode<synchronous>, transform_indices = @transform_11, window_bounds = array<i64: 2, 1, 32>}, {pipeline_mode = #tpu.pipeline_mode<synchronous>, transform_indices = @transform_12, window_bounds = array<i64: 2, 1, 32>}, {pipeline_mode = #tpu.pipeline_mode<synchronous>, transform_indices = @transform_13, window_bounds = array<i64: 2, 1, 32>}, {transform_indices = @transform_14, window_bounds = array<i64: 1, 1, 32>}]} {
    %c0 = arith.constant 0 : index
    %c0_0 = arith.constant 0 : index
    %c0_1 = arith.constant 0 : index
    %0 = vector.load %arg1[%c0, %c0_0, %c0_1] : memref<1x8x32xf32, #tpu.memory_space<vmem>>, vector<1x8x32xf32>
    %1 = vector.shape_cast %0 : vector<1x8x32xf32> to vector<8x32xf32>
    %c0_2 = arith.constant 0 : index
    %c0_3 = arith.constant 0 : index
    %c0_4 = arith.constant 0 : index
    %2 = vector.load %arg2[%c0_2, %c0_3, %c0_4] : memref<1x1x8xf32, #tpu.memory_space<vmem>>, vector<1x1x8xf32>
    %3 = vector.shape_cast %2 : vector<1x1x8xf32> to vector<1x8xf32>
    %cst = arith.constant 1.000000e+00 : f32
    %4 = vector.broadcast %cst : f32 to vector<1x8xf32>
    %5 = arith.subf %3, %4 : vector<1x8xf32>
    %cst_5 = arith.constant 1.000000e+09 : f32
    %6 = vector.broadcast %cst_5 : f32 to vector<1x8xf32>
    %7 = arith.mulf %5, %6 : vector<1x8xf32>
    %8 = arith.truncf %1 : vector<8x32xf32> to vector<8x32xbf16>
    %c0_6 = arith.constant 0 : index
    %c0_7 = arith.constant 0 : index
    %c0_8 = arith.constant 0 : index
    %9 = vector.load %arg3[%c0_6, %c0_7, %c0_8] : memref<2x32x96xbf16, #tpu.memory_space<vmem>>, vector<1x32x96xbf16>
    %10 = vector.shape_cast %9 : vector<1x32x96xbf16> to vector<32x96xbf16>
    %cst_9 = arith.constant dense<0.000000e+00> : vector<8x96xf32>
    %11 = tpu.matmul %8, %10, %cst_9 {dimension_numbers = #tpu.dot_dimension_numbers<[1], [0], [0], [1], [0, 0, 1, 1], [], []>} : vector<8x32xbf16>, vector<32x96xbf16>, vector<8x96xf32> -> vector<8x96xf32>
    %c0_10 = arith.constant 0 : index
    %c0_11 = arith.constant 0 : index
    %c0_12 = arith.constant 0 : index
    %12 = vector.load %arg4[%c0_10, %c0_11, %c0_12] : memref<2x1x96xf32, #tpu.memory_space<vmem>>, vector<1x1x96xf32>
    %13 = vector.shape_cast %12 : vector<1x1x96xf32> to vector<1x96xf32>
    %14 = vector.broadcast %13 : vector<1x96xf32> to vector<8x96xf32>
    %15 = arith.addf %11, %14 : vector<8x96xf32>
    %16 = arith.truncf %15 : vector<8x96xf32> to vector<8x96xbf16>
    %17 = vector.extract_strided_slice %16 {offsets = [0, 0], sizes = [8, 8], strides = [1, 1]} : vector<8x96xbf16> to vector<8x8xbf16>
    %18 = vector.extract_strided_slice %16 {offsets = [0, 32], sizes = [8, 8], strides = [1, 1]} : vector<8x96xbf16> to vector<8x8xbf16>
    %cst_13 = arith.constant dense<0.000000e+00> : vector<8x8xf32>
    %19 = tpu.matmul %17, %18, %cst_13 {dimension_numbers = #tpu.dot_dimension_numbers<[1], [1], [0], [0], [0, 0, 1, 0], [], []>} : vector<8x8xbf16>, vector<8x8xbf16>, vector<8x8xf32> -> vector<8x8xf32>
    %20 = vector.extract_strided_slice %16 {offsets = [0, 8], sizes = [8, 8], strides = [1, 1]} : vector<8x96xbf16> to vector<8x8xbf16>
    %21 = vector.extract_strided_slice %16 {offsets = [0, 40], sizes = [8, 8], strides = [1, 1]} : vector<8x96xbf16> to vector<8x8xbf16>
    %cst_14 = arith.constant dense<0.000000e+00> : vector<8x8xf32>
    %22 = tpu.matmul %20, %21, %cst_14 {dimension_numbers = #tpu.dot_dimension_numbers<[1], [1], [0], [0], [0, 0, 1, 0], [], []>} : vector<8x8xbf16>, vector<8x8xbf16>, vector<8x8xf32> -> vector<8x8xf32>
    %23 = vector.extract_strided_slice %16 {offsets = [0, 16], sizes = [8, 8], strides = [1, 1]} : vector<8x96xbf16> to vector<8x8xbf16>
    %24 = vector.extract_strided_slice %16 {offsets = [0, 48], sizes = [8, 8], strides = [1, 1]} : vector<8x96xbf16> to vector<8x8xbf16>
    %cst_15 = arith.constant dense<0.000000e+00> : vector<8x8xf32>
    %25 = tpu.matmul %23, %24, %cst_15 {dimension_numbers = #tpu.dot_dimension_numbers<[1], [1], [0], [0], [0, 0, 1, 0], [], []>} : vector<8x8xbf16>, vector<8x8xbf16>, vector<8x8xf32> -> vector<8x8xf32>
    %26 = vector.extract_strided_slice %16 {offsets = [0, 24], sizes = [8, 8], strides = [1, 1]} : vector<8x96xbf16> to vector<8x8xbf16>
    %27 = vector.extract_strided_slice %16 {offsets = [0, 56], sizes = [8, 8], strides = [1, 1]} : vector<8x96xbf16> to vector<8x8xbf16>
    %cst_16 = arith.constant dense<0.000000e+00> : vector<8x8xf32>
    %28 = tpu.matmul %26, %27, %cst_16 {dimension_numbers = #tpu.dot_dimension_numbers<[1], [1], [0], [0], [0, 0, 1, 0], [], []>} : vector<8x8xbf16>, vector<8x8xbf16>, vector<8x8xf32> -> vector<8x8xf32>
    %29 = tpu.concatenate %19, %22, %25, %28 in 0 : vector<8x8xf32>, vector<8x8xf32>, vector<8x8xf32>, vector<8x8xf32> -> vector<32x8xf32>
    %30 = vector.broadcast %7 : vector<1x8xf32> to vector<32x8xf32>
    %31 = arith.addf %29, %30 : vector<32x8xf32>
    %cst_17 = arith.constant dense<0xFF800000> : vector<32xf32>
    %32 = vector.multi_reduction <maximumf>, %31, %cst_17 [1] : vector<32x8xf32> to vector<32xf32>
    %33 = vector.shape_cast %32 : vector<32xf32> to vector<32x1xf32>
    %34 = vector.broadcast %33 : vector<32x1xf32> to vector<32x8xf32>
    %35 = arith.subf %31, %34 : vector<32x8xf32>
    %36 = math.exp %35 : vector<32x8xf32>
    %cst_18 = arith.constant dense<0.000000e+00> : vector<32xf32>
    %37 = vector.multi_reduction <add>, %36, %cst_18 [1] : vector<32x8xf32> to vector<32xf32>
    %38 = vector.shape_cast %37 : vector<32xf32> to vector<32x1xf32>
    %39 = tpu.reciprocal %38 {approx = true} : vector<32x1xf32> -> vector<32x1xf32>
    %40 = vector.broadcast %39 : vector<32x1xf32> to vector<32x8xf32>
    %41 = arith.mulf %36, %40 : vector<32x8xf32>
    %42 = vector.extract_strided_slice %41 {offsets = [0, 0], sizes = [8, 8], strides = [1, 1]} : vector<32x8xf32> to vector<8x8xf32>
    %43 = arith.truncf %42 : vector<8x8xf32> to vector<8x8xbf16>
    %44 = vector.extract_strided_slice %16 {offsets = [0, 64], sizes = [8, 8], strides = [1, 1]} : vector<8x96xbf16> to vector<8x8xbf16>
    %cst_19 = arith.constant dense<0.000000e+00> : vector<8x8xf32>
    %45 = tpu.matmul %43, %44, %cst_19 {dimension_numbers = #tpu.dot_dimension_numbers<[1], [0], [0], [1], [0, 0, 1, 1], [], []>} : vector<8x8xbf16>, vector<8x8xbf16>, vector<8x8xf32> -> vector<8x8xf32>
    %46 = vector.extract_strided_slice %41 {offsets = [8, 0], sizes = [8, 8], strides = [1, 1]} : vector<32x8xf32> to vector<8x8xf32>
    %47 = arith.truncf %46 : vector<8x8xf32> to vector<8x8xbf16>
    %48 = vector.extract_strided_slice %16 {offsets = [0, 72], sizes = [8, 8], strides = [1, 1]} : vector<8x96xbf16> to vector<8x8xbf16>
    %cst_20 = arith.constant dense<0.000000e+00> : vector<8x8xf32>
    %49 = tpu.matmul %47, %48, %cst_20 {dimension_numbers = #tpu.dot_dimension_numbers<[1], [0], [0], [1], [0, 0, 1, 1], [], []>} : vector<8x8xbf16>, vector<8x8xbf16>, vector<8x8xf32> -> vector<8x8xf32>
    %50 = vector.extract_strided_slice %41 {offsets = [16, 0], sizes = [8, 8], strides = [1, 1]} : vector<32x8xf32> to vector<8x8xf32>
    %51 = arith.truncf %50 : vector<8x8xf32> to vector<8x8xbf16>
    %52 = vector.extract_strided_slice %16 {offsets = [0, 80], sizes = [8, 8], strides = [1, 1]} : vector<8x96xbf16> to vector<8x8xbf16>
    %cst_21 = arith.constant dense<0.000000e+00> : vector<8x8xf32>
    %53 = tpu.matmul %51, %52, %cst_21 {dimension_numbers = #tpu.dot_dimension_numbers<[1], [0], [0], [1], [0, 0, 1, 1], [], []>} : vector<8x8xbf16>, vector<8x8xbf16>, vector<8x8xf32> -> vector<8x8xf32>
    %54 = vector.extract_strided_slice %41 {offsets = [24, 0], sizes = [8, 8], strides = [1, 1]} : vector<32x8xf32> to vector<8x8xf32>
    %55 = arith.truncf %54 : vector<8x8xf32> to vector<8x8xbf16>
    %56 = vector.extract_strided_slice %16 {offsets = [0, 88], sizes = [8, 8], strides = [1, 1]} : vector<8x96xbf16> to vector<8x8xbf16>
    %cst_22 = arith.constant dense<0.000000e+00> : vector<8x8xf32>
    %57 = tpu.matmul %55, %56, %cst_22 {dimension_numbers = #tpu.dot_dimension_numbers<[1], [0], [0], [1], [0, 0, 1, 1], [], []>} : vector<8x8xbf16>, vector<8x8xbf16>, vector<8x8xf32> -> vector<8x8xf32>
    %58 = tpu.concatenate %45, %49, %53, %57 in 1 : vector<8x8xf32>, vector<8x8xf32>, vector<8x8xf32>, vector<8x8xf32> -> vector<8x32xf32>
    %59 = arith.truncf %58 : vector<8x32xf32> to vector<8x32xbf16>
    %c0_23 = arith.constant 0 : index
    %c0_24 = arith.constant 0 : index
    %c0_25 = arith.constant 0 : index
    %60 = vector.load %arg5[%c0_23, %c0_24, %c0_25] : memref<2x32x32xbf16, #tpu.memory_space<vmem>>, vector<1x32x32xbf16>
    %61 = vector.shape_cast %60 : vector<1x32x32xbf16> to vector<32x32xbf16>
    %cst_26 = arith.constant dense<0.000000e+00> : vector<8x32xf32>
    %62 = tpu.matmul %59, %61, %cst_26 {dimension_numbers = #tpu.dot_dimension_numbers<[1], [0], [0], [1], [0, 0, 1, 1], [], []>} : vector<8x32xbf16>, vector<32x32xbf16>, vector<8x32xf32> -> vector<8x32xf32>
    %c0_27 = arith.constant 0 : index
    %c0_28 = arith.constant 0 : index
    %c0_29 = arith.constant 0 : index
    %63 = vector.load %arg6[%c0_27, %c0_28, %c0_29] : memref<2x1x32xf32, #tpu.memory_space<vmem>>, vector<1x1x32xf32>
    %64 = vector.shape_cast %63 : vector<1x1x32xf32> to vector<1x32xf32>
    %65 = vector.broadcast %64 : vector<1x32xf32> to vector<8x32xf32>
    %66 = arith.addf %62, %65 : vector<8x32xf32>
    %67 = arith.addf %1, %66 : vector<8x32xf32>
    %c0_30 = arith.constant 0 : index
    %c0_31 = arith.constant 0 : index
    %c0_32 = arith.constant 0 : index
    %68 = vector.load %arg7[%c0_30, %c0_31, %c0_32] : memref<2x1x32xf32, #tpu.memory_space<vmem>>, vector<1x1x32xf32>
    %69 = vector.shape_cast %68 : vector<1x1x32xf32> to vector<1x32xf32>
    %c0_33 = arith.constant 0 : index
    %c0_34 = arith.constant 0 : index
    %c0_35 = arith.constant 0 : index
    %70 = vector.load %arg8[%c0_33, %c0_34, %c0_35] : memref<2x1x32xf32, #tpu.memory_space<vmem>>, vector<1x1x32xf32>
    %71 = vector.shape_cast %70 : vector<1x1x32xf32> to vector<1x32xf32>
    %cst_36 = arith.constant dense<0.000000e+00> : vector<8xf32>
    %72 = vector.multi_reduction <add>, %67, %cst_36 [1] : vector<8x32xf32> to vector<8xf32>
    %73 = vector.shape_cast %72 : vector<8xf32> to vector<8x1xf32>
    %cst_37 = arith.constant 3.200000e+01 : f32
    %74 = vector.broadcast %cst_37 : f32 to vector<8x1xf32>
    %75 = arith.divf %73, %74 : vector<8x1xf32>
    %76 = vector.broadcast %75 : vector<8x1xf32> to vector<8x32xf32>
    %77 = arith.subf %67, %76 : vector<8x32xf32>
    %78 = arith.mulf %77, %77 : vector<8x32xf32>
    %cst_38 = arith.constant dense<0.000000e+00> : vector<8xf32>
    %79 = vector.multi_reduction <add>, %78, %cst_38 [1] : vector<8x32xf32> to vector<8xf32>
    %80 = vector.shape_cast %79 : vector<8xf32> to vector<8x1xf32>
    %cst_39 = arith.constant 3.200000e+01 : f32
    %81 = vector.broadcast %cst_39 : f32 to vector<8x1xf32>
    %82 = arith.divf %80, %81 : vector<8x1xf32>
    %83 = vector.broadcast %75 : vector<8x1xf32> to vector<8x32xf32>
    %84 = arith.subf %67, %83 : vector<8x32xf32>
    %cst_40 = arith.constant 9.99999996E-13 : f32
    %85 = vector.broadcast %cst_40 : f32 to vector<8x1xf32>
    %86 = arith.addf %82, %85 : vector<8x1xf32>
    %87 = math.rsqrt %86 : vector<8x1xf32>
    %88 = vector.broadcast %87 : vector<8x1xf32> to vector<8x32xf32>
    %89 = arith.mulf %84, %88 : vector<8x32xf32>
    %90 = vector.broadcast %69 : vector<1x32xf32> to vector<8x32xf32>
    %91 = arith.mulf %89, %90 : vector<8x32xf32>
    %92 = vector.broadcast %71 : vector<1x32xf32> to vector<8x32xf32>
    %93 = arith.addf %91, %92 : vector<8x32xf32>
    %94 = arith.truncf %93 : vector<8x32xf32> to vector<8x32xbf16>
    %c0_41 = arith.constant 0 : index
    %c0_42 = arith.constant 0 : index
    %c0_43 = arith.constant 0 : index
    %95 = vector.load %arg9[%c0_41, %c0_42, %c0_43] : memref<2x32x64xbf16, #tpu.memory_space<vmem>>, vector<1x32x64xbf16>
    %96 = vector.shape_cast %95 : vector<1x32x64xbf16> to vector<32x64xbf16>
    %cst_44 = arith.constant dense<0.000000e+00> : vector<8x64xf32>
    %97 = tpu.matmul %94, %96, %cst_44 {dimension_numbers = #tpu.dot_dimension_numbers<[1], [0], [0], [1], [0, 0, 1, 1], [], []>} : vector<8x32xbf16>, vector<32x64xbf16>, vector<8x64xf32> -> vector<8x64xf32>
    %c0_45 = arith.constant 0 : index
    %c0_46 = arith.constant 0 : index
    %c0_47 = arith.constant 0 : index
    %98 = vector.load %arg10[%c0_45, %c0_46, %c0_47] : memref<2x1x64xf32, #tpu.memory_space<vmem>>, vector<1x1x64xf32>
    %99 = vector.shape_cast %98 : vector<1x1x64xf32> to vector<1x64xf32>
    %100 = vector.broadcast %99 : vector<1x64xf32> to vector<8x64xf32>
    %101 = arith.addf %97, %100 : vector<8x64xf32>
    %cst_48 = arith.constant 5.000000e-01 : f32
    %102 = vector.broadcast %cst_48 : f32 to vector<8x64xf32>
    %103 = arith.mulf %102, %101 : vector<8x64xf32>
    %cst_49 = arith.constant 4.471500e-02 : f32
    %104 = vector.broadcast %cst_49 : f32 to vector<8x64xf32>
    %105 = arith.mulf %104, %101 : vector<8x64xf32>
    %106 = arith.mulf %105, %101 : vector<8x64xf32>
    %107 = arith.mulf %106, %101 : vector<8x64xf32>
    %108 = arith.addf %101, %107 : vector<8x64xf32>
    %cst_50 = arith.constant 0.797884583 : f32
    %109 = vector.broadcast %cst_50 : f32 to vector<8x64xf32>
    %110 = arith.mulf %109, %108 : vector<8x64xf32>
    %111 = math.tanh %110 : vector<8x64xf32>
    %cst_51 = arith.constant 1.000000e+00 : f32
    %112 = vector.broadcast %cst_51 : f32 to vector<8x64xf32>
    %113 = arith.addf %112, %111 : vector<8x64xf32>
    %114 = arith.mulf %103, %113 : vector<8x64xf32>
    %115 = arith.truncf %114 : vector<8x64xf32> to vector<8x64xbf16>
    %c0_52 = arith.constant 0 : index
    %c0_53 = arith.constant 0 : index
    %c0_54 = arith.constant 0 : index
    %116 = vector.load %arg11[%c0_52, %c0_53, %c0_54] : memref<2x64x32xbf16, #tpu.memory_space<vmem>>, vector<1x64x32xbf16>
    %117 = vector.shape_cast %116 : vector<1x64x32xbf16> to vector<64x32xbf16>
    %cst_55 = arith.constant dense<0.000000e+00> : vector<8x32xf32>
    %118 = tpu.matmul %115, %117, %cst_55 {dimension_numbers = #tpu.dot_dimension_numbers<[1], [0], [0], [1], [0, 0, 1, 1], [], []>} : vector<8x64xbf16>, vector<64x32xbf16>, vector<8x32xf32> -> vector<8x32xf32>
    %c0_56 = arith.constant 0 : index
    %c0_57 = arith.constant 0 : index
    %c0_58 = arith.constant 0 : index
    %119 = vector.load %arg12[%c0_56, %c0_57, %c0_58] : memref<2x1x32xf32, #tpu.memory_space<vmem>>, vector<1x1x32xf32>
    %120 = vector.shape_cast %119 : vector<1x1x32xf32> to vector<1x32xf32>
    %121 = vector.broadcast %120 : vector<1x32xf32> to vector<8x32xf32>
    %122 = arith.addf %118, %121 : vector<8x32xf32>
    %123 = arith.addf %93, %122 : vector<8x32xf32>
    %c0_59 = arith.constant 0 : index
    %c0_60 = arith.constant 0 : index
    %c0_61 = arith.constant 0 : index
    %124 = vector.load %arg13[%c0_59, %c0_60, %c0_61] : memref<2x1x32xf32, #tpu.memory_space<vmem>>, vector<1x1x32xf32>
    %125 = vector.shape_cast %124 : vector<1x1x32xf32> to vector<1x32xf32>
    %c0_62 = arith.constant 0 : index
    %c0_63 = arith.constant 0 : index
    %c0_64 = arith.constant 0 : index
    %126 = vector.load %arg14[%c0_62, %c0_63, %c0_64] : memref<2x1x32xf32, #tpu.memory_space<vmem>>, vector<1x1x32xf32>
    %127 = vector.shape_cast %126 : vector<1x1x32xf32> to vector<1x32xf32>
    %cst_65 = arith.constant dense<0.000000e+00> : vector<8xf32>
    %128 = vector.multi_reduction <add>, %123, %cst_65 [1] : vector<8x32xf32> to vector<8xf32>
    %129 = vector.shape_cast %128 : vector<8xf32> to vector<8x1xf32>
    %cst_66 = arith.constant 3.200000e+01 : f32
    %130 = vector.broadcast %cst_66 : f32 to vector<8x1xf32>
    %131 = arith.divf %129, %130 : vector<8x1xf32>
    %132 = vector.broadcast %131 : vector<8x1xf32> to vector<8x32xf32>
    %133 = arith.subf %123, %132 : vector<8x32xf32>
    %134 = arith.mulf %133, %133 : vector<8x32xf32>
    %cst_67 = arith.constant dense<0.000000e+00> : vector<8xf32>
    %135 = vector.multi_reduction <add>, %134, %cst_67 [1] : vector<8x32xf32> to vector<8xf32>
    %136 = vector.shape_cast %135 : vector<8xf32> to vector<8x1xf32>
    %cst_68 = arith.constant 3.200000e+01 : f32
    %137 = vector.broadcast %cst_68 : f32 to vector<8x1xf32>
    %138 = arith.divf %136, %137 : vector<8x1xf32>
    %139 = vector.broadcast %131 : vector<8x1xf32> to vector<8x32xf32>
    %140 = arith.subf %123, %139 : vector<8x32xf32>
    %cst_69 = arith.constant 9.99999996E-13 : f32
    %141 = vector.broadcast %cst_69 : f32 to vector<8x1xf32>
    %142 = arith.addf %138, %141 : vector<8x1xf32>
    %143 = math.rsqrt %142 : vector<8x1xf32>
    %144 = vector.broadcast %143 : vector<8x1xf32> to vector<8x32xf32>
    %145 = arith.mulf %140, %144 : vector<8x32xf32>
    %146 = vector.broadcast %125 : vector<1x32xf32> to vector<8x32xf32>
    %147 = arith.mulf %145, %146 : vector<8x32xf32>
    %148 = vector.broadcast %127 : vector<1x32xf32> to vector<8x32xf32>
    %149 = arith.addf %147, %148 : vector<8x32xf32>
    %150 = arith.truncf %149 : vector<8x32xf32> to vector<8x32xbf16>
    %c1 = arith.constant 1 : index
    %c0_70 = arith.constant 0 : index
    %c0_71 = arith.constant 0 : index
    %151 = vector.load %arg3[%c1, %c0_70, %c0_71] : memref<2x32x96xbf16, #tpu.memory_space<vmem>>, vector<1x32x96xbf16>
    %152 = vector.shape_cast %151 : vector<1x32x96xbf16> to vector<32x96xbf16>
    %cst_72 = arith.constant dense<0.000000e+00> : vector<8x96xf32>
    %153 = tpu.matmul %150, %152, %cst_72 {dimension_numbers = #tpu.dot_dimension_numbers<[1], [0], [0], [1], [0, 0, 1, 1], [], []>} : vector<8x32xbf16>, vector<32x96xbf16>, vector<8x96xf32> -> vector<8x96xf32>
    %c1_73 = arith.constant 1 : index
    %c0_74 = arith.constant 0 : index
    %c0_75 = arith.constant 0 : index
    %154 = vector.load %arg4[%c1_73, %c0_74, %c0_75] : memref<2x1x96xf32, #tpu.memory_space<vmem>>, vector<1x1x96xf32>
    %155 = vector.shape_cast %154 : vector<1x1x96xf32> to vector<1x96xf32>
    %156 = vector.broadcast %155 : vector<1x96xf32> to vector<8x96xf32>
    %157 = arith.addf %153, %156 : vector<8x96xf32>
    %158 = arith.truncf %157 : vector<8x96xf32> to vector<8x96xbf16>
    %159 = vector.extract_strided_slice %158 {offsets = [0, 0], sizes = [8, 8], strides = [1, 1]} : vector<8x96xbf16> to vector<8x8xbf16>
    %160 = vector.extract_strided_slice %158 {offsets = [0, 32], sizes = [8, 8], strides = [1, 1]} : vector<8x96xbf16> to vector<8x8xbf16>
    %cst_76 = arith.constant dense<0.000000e+00> : vector<8x8xf32>
    %161 = tpu.matmul %159, %160, %cst_76 {dimension_numbers = #tpu.dot_dimension_numbers<[1], [1], [0], [0], [0, 0, 1, 0], [], []>} : vector<8x8xbf16>, vector<8x8xbf16>, vector<8x8xf32> -> vector<8x8xf32>
    %162 = vector.extract_strided_slice %158 {offsets = [0, 8], sizes = [8, 8], strides = [1, 1]} : vector<8x96xbf16> to vector<8x8xbf16>
    %163 = vector.extract_strided_slice %158 {offsets = [0, 40], sizes = [8, 8], strides = [1, 1]} : vector<8x96xbf16> to vector<8x8xbf16>
    %cst_77 = arith.constant dense<0.000000e+00> : vector<8x8xf32>
    %164 = tpu.matmul %162, %163, %cst_77 {dimension_numbers = #tpu.dot_dimension_numbers<[1], [1], [0], [0], [0, 0, 1, 0], [], []>} : vector<8x8xbf16>, vector<8x8xbf16>, vector<8x8xf32> -> vector<8x8xf32>
    %165 = vector.extract_strided_slice %158 {offsets = [0, 16], sizes = [8, 8], strides = [1, 1]} : vector<8x96xbf16> to vector<8x8xbf16>
    %166 = vector.extract_strided_slice %158 {offsets = [0, 48], sizes = [8, 8], strides = [1, 1]} : vector<8x96xbf16> to vector<8x8xbf16>
    %cst_78 = arith.constant dense<0.000000e+00> : vector<8x8xf32>
    %167 = tpu.matmul %165, %166, %cst_78 {dimension_numbers = #tpu.dot_dimension_numbers<[1], [1], [0], [0], [0, 0, 1, 0], [], []>} : vector<8x8xbf16>, vector<8x8xbf16>, vector<8x8xf32> -> vector<8x8xf32>
    %168 = vector.extract_strided_slice %158 {offsets = [0, 24], sizes = [8, 8], strides = [1, 1]} : vector<8x96xbf16> to vector<8x8xbf16>
    %169 = vector.extract_strided_slice %158 {offsets = [0, 56], sizes = [8, 8], strides = [1, 1]} : vector<8x96xbf16> to vector<8x8xbf16>
    %cst_79 = arith.constant dense<0.000000e+00> : vector<8x8xf32>
    %170 = tpu.matmul %168, %169, %cst_79 {dimension_numbers = #tpu.dot_dimension_numbers<[1], [1], [0], [0], [0, 0, 1, 0], [], []>} : vector<8x8xbf16>, vector<8x8xbf16>, vector<8x8xf32> -> vector<8x8xf32>
    %171 = tpu.concatenate %161, %164, %167, %170 in 0 : vector<8x8xf32>, vector<8x8xf32>, vector<8x8xf32>, vector<8x8xf32> -> vector<32x8xf32>
    %172 = vector.broadcast %7 : vector<1x8xf32> to vector<32x8xf32>
    %173 = arith.addf %171, %172 : vector<32x8xf32>
    %cst_80 = arith.constant dense<0xFF800000> : vector<32xf32>
    %174 = vector.multi_reduction <maximumf>, %173, %cst_80 [1] : vector<32x8xf32> to vector<32xf32>
    %175 = vector.shape_cast %174 : vector<32xf32> to vector<32x1xf32>
    %176 = vector.broadcast %175 : vector<32x1xf32> to vector<32x8xf32>
    %177 = arith.subf %173, %176 : vector<32x8xf32>
    %178 = math.exp %177 : vector<32x8xf32>
    %cst_81 = arith.constant dense<0.000000e+00> : vector<32xf32>
    %179 = vector.multi_reduction <add>, %178, %cst_81 [1] : vector<32x8xf32> to vector<32xf32>
    %180 = vector.shape_cast %179 : vector<32xf32> to vector<32x1xf32>
    %181 = tpu.reciprocal %180 {approx = true} : vector<32x1xf32> -> vector<32x1xf32>
    %182 = vector.broadcast %181 : vector<32x1xf32> to vector<32x8xf32>
    %183 = arith.mulf %178, %182 : vector<32x8xf32>
    %184 = vector.extract_strided_slice %183 {offsets = [0, 0], sizes = [8, 8], strides = [1, 1]} : vector<32x8xf32> to vector<8x8xf32>
    %185 = arith.truncf %184 : vector<8x8xf32> to vector<8x8xbf16>
    %186 = vector.extract_strided_slice %158 {offsets = [0, 64], sizes = [8, 8], strides = [1, 1]} : vector<8x96xbf16> to vector<8x8xbf16>
    %cst_82 = arith.constant dense<0.000000e+00> : vector<8x8xf32>
    %187 = tpu.matmul %185, %186, %cst_82 {dimension_numbers = #tpu.dot_dimension_numbers<[1], [0], [0], [1], [0, 0, 1, 1], [], []>} : vector<8x8xbf16>, vector<8x8xbf16>, vector<8x8xf32> -> vector<8x8xf32>
    %188 = vector.extract_strided_slice %183 {offsets = [8, 0], sizes = [8, 8], strides = [1, 1]} : vector<32x8xf32> to vector<8x8xf32>
    %189 = arith.truncf %188 : vector<8x8xf32> to vector<8x8xbf16>
    %190 = vector.extract_strided_slice %158 {offsets = [0, 72], sizes = [8, 8], strides = [1, 1]} : vector<8x96xbf16> to vector<8x8xbf16>
    %cst_83 = arith.constant dense<0.000000e+00> : vector<8x8xf32>
    %191 = tpu.matmul %189, %190, %cst_83 {dimension_numbers = #tpu.dot_dimension_numbers<[1], [0], [0], [1], [0, 0, 1, 1], [], []>} : vector<8x8xbf16>, vector<8x8xbf16>, vector<8x8xf32> -> vector<8x8xf32>
    %192 = vector.extract_strided_slice %183 {offsets = [16, 0], sizes = [8, 8], strides = [1, 1]} : vector<32x8xf32> to vector<8x8xf32>
    %193 = arith.truncf %192 : vector<8x8xf32> to vector<8x8xbf16>
    %194 = vector.extract_strided_slice %158 {offsets = [0, 80], sizes = [8, 8], strides = [1, 1]} : vector<8x96xbf16> to vector<8x8xbf16>
    %cst_84 = arith.constant dense<0.000000e+00> : vector<8x8xf32>
    %195 = tpu.matmul %193, %194, %cst_84 {dimension_numbers = #tpu.dot_dimension_numbers<[1], [0], [0], [1], [0, 0, 1, 1], [], []>} : vector<8x8xbf16>, vector<8x8xbf16>, vector<8x8xf32> -> vector<8x8xf32>
    %196 = vector.extract_strided_slice %183 {offsets = [24, 0], sizes = [8, 8], strides = [1, 1]} : vector<32x8xf32> to vector<8x8xf32>
    %197 = arith.truncf %196 : vector<8x8xf32> to vector<8x8xbf16>
    %198 = vector.extract_strided_slice %158 {offsets = [0, 88], sizes = [8, 8], strides = [1, 1]} : vector<8x96xbf16> to vector<8x8xbf16>
    %cst_85 = arith.constant dense<0.000000e+00> : vector<8x8xf32>
    %199 = tpu.matmul %197, %198, %cst_85 {dimension_numbers = #tpu.dot_dimension_numbers<[1], [0], [0], [1], [0, 0, 1, 1], [], []>} : vector<8x8xbf16>, vector<8x8xbf16>, vector<8x8xf32> -> vector<8x8xf32>
    %200 = tpu.concatenate %187, %191, %195, %199 in 1 : vector<8x8xf32>, vector<8x8xf32>, vector<8x8xf32>, vector<8x8xf32> -> vector<8x32xf32>
    %201 = arith.truncf %200 : vector<8x32xf32> to vector<8x32xbf16>
    %c1_86 = arith.constant 1 : index
    %c0_87 = arith.constant 0 : index
    %c0_88 = arith.constant 0 : index
    %202 = vector.load %arg5[%c1_86, %c0_87, %c0_88] : memref<2x32x32xbf16, #tpu.memory_space<vmem>>, vector<1x32x32xbf16>
    %203 = vector.shape_cast %202 : vector<1x32x32xbf16> to vector<32x32xbf16>
    %cst_89 = arith.constant dense<0.000000e+00> : vector<8x32xf32>
    %204 = tpu.matmul %201, %203, %cst_89 {dimension_numbers = #tpu.dot_dimension_numbers<[1], [0], [0], [1], [0, 0, 1, 1], [], []>} : vector<8x32xbf16>, vector<32x32xbf16>, vector<8x32xf32> -> vector<8x32xf32>
    %c1_90 = arith.constant 1 : index
    %c0_91 = arith.constant 0 : index
    %c0_92 = arith.constant 0 : index
    %205 = vector.load %arg6[%c1_90, %c0_91, %c0_92] : memref<2x1x32xf32, #tpu.memory_space<vmem>>, vector<1x1x32xf32>
    %206 = vector.shape_cast %205 : vector<1x1x32xf32> to vector<1x32xf32>
    %207 = vector.broadcast %206 : vector<1x32xf32> to vector<8x32xf32>
    %208 = arith.addf %204, %207 : vector<8x32xf32>
    %209 = arith.addf %149, %208 : vector<8x32xf32>
    %c1_93 = arith.constant 1 : index
    %c0_94 = arith.constant 0 : index
    %c0_95 = arith.constant 0 : index
    %210 = vector.load %arg7[%c1_93, %c0_94, %c0_95] : memref<2x1x32xf32, #tpu.memory_space<vmem>>, vector<1x1x32xf32>
    %211 = vector.shape_cast %210 : vector<1x1x32xf32> to vector<1x32xf32>
    %c1_96 = arith.constant 1 : index
    %c0_97 = arith.constant 0 : index
    %c0_98 = arith.constant 0 : index
    %212 = vector.load %arg8[%c1_96, %c0_97, %c0_98] : memref<2x1x32xf32, #tpu.memory_space<vmem>>, vector<1x1x32xf32>
    %213 = vector.shape_cast %212 : vector<1x1x32xf32> to vector<1x32xf32>
    %cst_99 = arith.constant dense<0.000000e+00> : vector<8xf32>
    %214 = vector.multi_reduction <add>, %209, %cst_99 [1] : vector<8x32xf32> to vector<8xf32>
    %215 = vector.shape_cast %214 : vector<8xf32> to vector<8x1xf32>
    %cst_100 = arith.constant 3.200000e+01 : f32
    %216 = vector.broadcast %cst_100 : f32 to vector<8x1xf32>
    %217 = arith.divf %215, %216 : vector<8x1xf32>
    %218 = vector.broadcast %217 : vector<8x1xf32> to vector<8x32xf32>
    %219 = arith.subf %209, %218 : vector<8x32xf32>
    %220 = arith.mulf %219, %219 : vector<8x32xf32>
    %cst_101 = arith.constant dense<0.000000e+00> : vector<8xf32>
    %221 = vector.multi_reduction <add>, %220, %cst_101 [1] : vector<8x32xf32> to vector<8xf32>
    %222 = vector.shape_cast %221 : vector<8xf32> to vector<8x1xf32>
    %cst_102 = arith.constant 3.200000e+01 : f32
    %223 = vector.broadcast %cst_102 : f32 to vector<8x1xf32>
    %224 = arith.divf %222, %223 : vector<8x1xf32>
    %225 = vector.broadcast %217 : vector<8x1xf32> to vector<8x32xf32>
    %226 = arith.subf %209, %225 : vector<8x32xf32>
    %cst_103 = arith.constant 9.99999996E-13 : f32
    %227 = vector.broadcast %cst_103 : f32 to vector<8x1xf32>
    %228 = arith.addf %224, %227 : vector<8x1xf32>
    %229 = math.rsqrt %228 : vector<8x1xf32>
    %230 = vector.broadcast %229 : vector<8x1xf32> to vector<8x32xf32>
    %231 = arith.mulf %226, %230 : vector<8x32xf32>
    %232 = vector.broadcast %211 : vector<1x32xf32> to vector<8x32xf32>
    %233 = arith.mulf %231, %232 : vector<8x32xf32>
    %234 = vector.broadcast %213 : vector<1x32xf32> to vector<8x32xf32>
    %235 = arith.addf %233, %234 : vector<8x32xf32>
    %236 = arith.truncf %235 : vector<8x32xf32> to vector<8x32xbf16>
    %c1_104 = arith.constant 1 : index
    %c0_105 = arith.constant 0 : index
    %c0_106 = arith.constant 0 : index
    %237 = vector.load %arg9[%c1_104, %c0_105, %c0_106] : memref<2x32x64xbf16, #tpu.memory_space<vmem>>, vector<1x32x64xbf16>
    %238 = vector.shape_cast %237 : vector<1x32x64xbf16> to vector<32x64xbf16>
    %cst_107 = arith.constant dense<0.000000e+00> : vector<8x64xf32>
    %239 = tpu.matmul %236, %238, %cst_107 {dimension_numbers = #tpu.dot_dimension_numbers<[1], [0], [0], [1], [0, 0, 1, 1], [], []>} : vector<8x32xbf16>, vector<32x64xbf16>, vector<8x64xf32> -> vector<8x64xf32>
    %c1_108 = arith.constant 1 : index
    %c0_109 = arith.constant 0 : index
    %c0_110 = arith.constant 0 : index
    %240 = vector.load %arg10[%c1_108, %c0_109, %c0_110] : memref<2x1x64xf32, #tpu.memory_space<vmem>>, vector<1x1x64xf32>
    %241 = vector.shape_cast %240 : vector<1x1x64xf32> to vector<1x64xf32>
    %242 = vector.broadcast %241 : vector<1x64xf32> to vector<8x64xf32>
    %243 = arith.addf %239, %242 : vector<8x64xf32>
    %cst_111 = arith.constant 5.000000e-01 : f32
    %244 = vector.broadcast %cst_111 : f32 to vector<8x64xf32>
    %245 = arith.mulf %244, %243 : vector<8x64xf32>
    %cst_112 = arith.constant 4.471500e-02 : f32
    %246 = vector.broadcast %cst_112 : f32 to vector<8x64xf32>
    %247 = arith.mulf %246, %243 : vector<8x64xf32>
    %248 = arith.mulf %247, %243 : vector<8x64xf32>
    %249 = arith.mulf %248, %243 : vector<8x64xf32>
    %250 = arith.addf %243, %249 : vector<8x64xf32>
    %cst_113 = arith.constant 0.797884583 : f32
    %251 = vector.broadcast %cst_113 : f32 to vector<8x64xf32>
    %252 = arith.mulf %251, %250 : vector<8x64xf32>
    %253 = math.tanh %252 : vector<8x64xf32>
    %cst_114 = arith.constant 1.000000e+00 : f32
    %254 = vector.broadcast %cst_114 : f32 to vector<8x64xf32>
    %255 = arith.addf %254, %253 : vector<8x64xf32>
    %256 = arith.mulf %245, %255 : vector<8x64xf32>
    %257 = arith.truncf %256 : vector<8x64xf32> to vector<8x64xbf16>
    %c1_115 = arith.constant 1 : index
    %c0_116 = arith.constant 0 : index
    %c0_117 = arith.constant 0 : index
    %258 = vector.load %arg11[%c1_115, %c0_116, %c0_117] : memref<2x64x32xbf16, #tpu.memory_space<vmem>>, vector<1x64x32xbf16>
    %259 = vector.shape_cast %258 : vector<1x64x32xbf16> to vector<64x32xbf16>
    %cst_118 = arith.constant dense<0.000000e+00> : vector<8x32xf32>
    %260 = tpu.matmul %257, %259, %cst_118 {dimension_numbers = #tpu.dot_dimension_numbers<[1], [0], [0], [1], [0, 0, 1, 1], [], []>} : vector<8x64xbf16>, vector<64x32xbf16>, vector<8x32xf32> -> vector<8x32xf32>
    %c1_119 = arith.constant 1 : index
    %c0_120 = arith.constant 0 : index
    %c0_121 = arith.constant 0 : index
    %261 = vector.load %arg12[%c1_119, %c0_120, %c0_121] : memref<2x1x32xf32, #tpu.memory_space<vmem>>, vector<1x1x32xf32>
    %262 = vector.shape_cast %261 : vector<1x1x32xf32> to vector<1x32xf32>
    %263 = vector.broadcast %262 : vector<1x32xf32> to vector<8x32xf32>
    %264 = arith.addf %260, %263 : vector<8x32xf32>
    %265 = arith.addf %235, %264 : vector<8x32xf32>
    %c1_122 = arith.constant 1 : index
    %c0_123 = arith.constant 0 : index
    %c0_124 = arith.constant 0 : index
    %266 = vector.load %arg13[%c1_122, %c0_123, %c0_124] : memref<2x1x32xf32, #tpu.memory_space<vmem>>, vector<1x1x32xf32>
    %267 = vector.shape_cast %266 : vector<1x1x32xf32> to vector<1x32xf32>
    %c1_125 = arith.constant 1 : index
    %c0_126 = arith.constant 0 : index
    %c0_127 = arith.constant 0 : index
    %268 = vector.load %arg14[%c1_125, %c0_126, %c0_127] : memref<2x1x32xf32, #tpu.memory_space<vmem>>, vector<1x1x32xf32>
    %269 = vector.shape_cast %268 : vector<1x1x32xf32> to vector<1x32xf32>
    %cst_128 = arith.constant dense<0.000000e+00> : vector<8xf32>
    %270 = vector.multi_reduction <add>, %265, %cst_128 [1] : vector<8x32xf32> to vector<8xf32>
    %271 = vector.shape_cast %270 : vector<8xf32> to vector<8x1xf32>
    %cst_129 = arith.constant 3.200000e+01 : f32
    %272 = vector.broadcast %cst_129 : f32 to vector<8x1xf32>
    %273 = arith.divf %271, %272 : vector<8x1xf32>
    %274 = vector.broadcast %273 : vector<8x1xf32> to vector<8x32xf32>
    %275 = arith.subf %265, %274 : vector<8x32xf32>
    %276 = arith.mulf %275, %275 : vector<8x32xf32>
    %cst_130 = arith.constant dense<0.000000e+00> : vector<8xf32>
    %277 = vector.multi_reduction <add>, %276, %cst_130 [1] : vector<8x32xf32> to vector<8xf32>
    %278 = vector.shape_cast %277 : vector<8xf32> to vector<8x1xf32>
    %cst_131 = arith.constant 3.200000e+01 : f32
    %279 = vector.broadcast %cst_131 : f32 to vector<8x1xf32>
    %280 = arith.divf %278, %279 : vector<8x1xf32>
    %281 = vector.broadcast %273 : vector<8x1xf32> to vector<8x32xf32>
    %282 = arith.subf %265, %281 : vector<8x32xf32>
    %cst_132 = arith.constant 9.99999996E-13 : f32
    %283 = vector.broadcast %cst_132 : f32 to vector<8x1xf32>
    %284 = arith.addf %280, %283 : vector<8x1xf32>
    %285 = math.rsqrt %284 : vector<8x1xf32>
    %286 = vector.broadcast %285 : vector<8x1xf32> to vector<8x32xf32>
    %287 = arith.mulf %282, %286 : vector<8x32xf32>
    %288 = vector.broadcast %267 : vector<1x32xf32> to vector<8x32xf32>
    %289 = arith.mulf %287, %288 : vector<8x32xf32>
    %290 = vector.broadcast %269 : vector<1x32xf32> to vector<8x32xf32>
    %291 = arith.addf %289, %290 : vector<8x32xf32>
    %cst_133 = arith.constant dense<0.000000e+00> : vector<1x32xf32>
    %292 = tpu.matmul %3, %291, %cst_133 {dimension_numbers = #tpu.dot_dimension_numbers<[1], [0], [0], [1], [0, 0, 1, 1], [], []>} : vector<1x8xf32>, vector<8x32xf32>, vector<1x32xf32> -> vector<1x32xf32>
    %cst_134 = arith.constant dense<0.000000e+00> : vector<1xf32>
    %293 = vector.multi_reduction <add>, %3, %cst_134 [1] : vector<1x8xf32> to vector<1xf32>
    %294 = vector.shape_cast %293 : vector<1xf32> to vector<1x1xf32>
    %cst_135 = arith.constant 9.99999971E-10 : f32
    %295 = vector.broadcast %cst_135 : f32 to vector<1x1xf32>
    %296 = arith.maximumf %294, %295 : vector<1x1xf32>
    %297 = vector.broadcast %296 : vector<1x1xf32> to vector<1x32xf32>
    %298 = arith.divf %292, %297 : vector<1x32xf32>
    %c0_136 = arith.constant 0 : index
    %c0_137 = arith.constant 0 : index
    %c0_138 = arith.constant 0 : index
    %299 = vector.load %arg15[%c0_136, %c0_137, %c0_138] : memref<1x1x32xf32, #tpu.memory_space<vmem>>, vector<1x1x32xf32>
    %300 = vector.shape_cast %299 : vector<1x1x32xf32> to vector<1x32xf32>
    %301 = vector.shape_cast %298 : vector<1x32xf32> to vector<1x1x32xf32>
    tpu.vector_store %arg15[%c0_136, %c0_137, %c0_138], %301 {strides = array<i32>} : memref<1x1x32xf32, #tpu.memory_space<vmem>>, vector<1x1x32xf32>,
    return
  }
  func.func @transform_0(%arg0: i32) -> (i32, i32, i32) {
    %c0_i32 = arith.constant 0 : i32
    %c0_i32_0 = arith.constant 0 : i32
    %c0_i32_1 = arith.constant 0 : i32
    return %arg0, %c0_i32, %c0_i32_0 : i32, i32, i32
  }
  func.func @transform_1(%arg0: i32) -> (i32, i32, i32) {
    %c0_i32 = arith.constant 0 : i32
    %c0_i32_0 = arith.constant 0 : i32
    %c0_i32_1 = arith.constant 0 : i32
    return %arg0, %c0_i32, %c0_i32_0 : i32, i32, i32
  }
  func.func @transform_2(%arg0: i32) -> (i32, i32, i32) {
    %c0_i32 = arith.constant 0 : i32
    %c0_i32_0 = arith.constant 0 : i32
    %c0_i32_1 = arith.constant 0 : i32
    %c0_i32_2 = arith.constant 0 : i32
    return %c0_i32, %c0_i32_0, %c0_i32_1 : i32, i32, i32
  }
  func.func @transform_3(%arg0: i32) -> (i32, i32, i32) {
    %c0_i32 = arith.constant 0 : i32
    %c0_i32_0 = arith.constant 0 : i32
    %c0_i32_1 = arith.constant 0 : i32
    %c0_i32_2 = arith.constant 0 : i32
    return %c0_i32, %c0_i32_0, %c0_i32_1 : i32, i32, i32
  }
  func.func @transform_4(%arg0: i32) -> (i32, i32, i32) {
    %c0_i32 = arith.constant 0 : i32
    %c0_i32_0 = arith.constant 0 : i32
    %c0_i32_1 = arith.constant 0 : i32
    %c0_i32_2 = arith.constant 0 : i32
    return %c0_i32, %c0_i32_0, %c0_i32_1 : i32, i32, i32
  }
  func.func @transform_5(%arg0: i32) -> (i32, i32, i32) {
    %c0_i32 = arith.constant 0 : i32
    %c0_i32_0 = arith.constant 0 : i32
    %c0_i32_1 = arith.constant 0 : i32
    %c0_i32_2 = arith.constant 0 : i32
    return %c0_i32, %c0_i32_0, %c0_i32_1 : i32, i32, i32
  }
  func.func @transform_6(%arg0: i32) -> (i32, i32, i32) {
    %c0_i32 = arith.constant 0 : i32
    %c0_i32_0 = arith.constant 0 : i32
    %c0_i32_1 = arith.constant 0 : i32
    %c0_i32_2 = arith.constant 0 : i32
    return %c0_i32, %c0_i32_0, %c0_i32_1 : i32, i32, i32
  }
  func.func @transform_7(%arg0: i32) -> (i32, i32, i32) {
    %c0_i32 = arith.constant 0 : i32
    %c0_i32_0 = arith.constant 0 : i32
    %c0_i32_1 = arith.constant 0 : i32
    %c0_i32_2 = arith.constant 0 : i32
    return %c0_i32, %c0_i32_0, %c0_i32_1 : i32, i32, i32
  }
  func.func @transform_8(%arg0: i32) -> (i32, i32, i32) {
    %c0_i32 = arith.constant 0 : i32
    %c0_i32_0 = arith.constant 0 : i32
    %c0_i32_1 = arith.constant 0 : i32
    %c0_i32_2 = arith.constant 0 : i32
    return %c0_i32, %c0_i32_0, %c0_i32_1 : i32, i32, i32
  }
  func.func @transform_9(%arg0: i32) -> (i32, i32, i32) {
    %c0_i32 = arith.constant 0 : i32
    %c0_i32_0 = arith.constant 0 : i32
    %c0_i32_1 = arith.constant 0 : i32
    %c0_i32_2 = arith.constant 0 : i32
    return %c0_i32, %c0_i32_0, %c0_i32_1 : i32, i32, i32
  }
  func.func @transform_10(%arg0: i32) -> (i32, i32, i32) {
    %c0_i32 = arith.constant 0 : i32
    %c0_i32_0 = arith.constant 0 : i32
    %c0_i32_1 = arith.constant 0 : i32
    %c0_i32_2 = arith.constant 0 : i32
    return %c0_i32, %c0_i32_0, %c0_i32_1 : i32, i32, i32
  }
  func.func @transform_11(%arg0: i32) -> (i32, i32, i32) {
    %c0_i32 = arith.constant 0 : i32
    %c0_i32_0 = arith.constant 0 : i32
    %c0_i32_1 = arith.constant 0 : i32
    %c0_i32_2 = arith.constant 0 : i32
    return %c0_i32, %c0_i32_0, %c0_i32_1 : i32, i32, i32
  }
  func.func @transform_12(%arg0: i32) -> (i32, i32, i32) {
    %c0_i32 = arith.constant 0 : i32
    %c0_i32_0 = arith.constant 0 : i32
    %c0_i32_1 = arith.constant 0 : i32
    %c0_i32_2 = arith.constant 0 : i32
    return %c0_i32, %c0_i32_0, %c0_i32_1 : i32, i32, i32
  }
  func.func @transform_13(%arg0: i32) -> (i32, i32, i32) {
    %c0_i32 = arith.constant 0 : i32
    %c0_i32_0 = arith.constant 0 : i32
    %c0_i32_1 = arith.constant 0 : i32
    %c0_i32_2 = arith.constant 0 : i32
    return %c0_i32, %c0_i32_0, %c0_i32_1 : i32, i32, i32
  }
  func.func @transform_14(%arg0: i32) -> (i32, i32, i32) {
    %c0_i32 = arith.constant 0 : i32
    %c0_i32_0 = arith.constant 0 : i32
    %c0_i32_1 = arith.constant 0 : i32
    return %arg0, %c0_i32, %c0_i32_0 : i32, i32, i32
  }
}

</mosaic_0001>

<bundles_post_ra>
// kernel: biencoder_forward.1
= control target key start
LH: loop header
LB: loop body
LE: loop exit
PB: predicated region body
PF: predicated region fallthrough
CT: control target
= control target key end

     0   :  { %s3344_s0 = inlined_call_operand.vmem [shape: f32[2,8,32], index: 0, kind: input, shape index: {}]   ;;  %s3345_s1 = inlined_call_operand.vmem [shape: f32[2,1,8], index: 1, kind: input, shape index: {}]   ;;  %s3346_s2 = inlined_call_operand.vmem [shape: bf16[2,32,96], index: 2, kind: input, shape index: {}]   ;;  %s3347_s3 = inlined_call_operand.vmem [shape: f32[2,1,96], index: 3, kind: input, shape index: {}]   ;;  %s3348_s4 = inlined_call_operand.vmem [shape: bf16[2,32,32], index: 4, kind: input, shape index: {}]   ;;  %s3349_s5 = inlined_call_operand.vmem [shape: f32[2,1,32], index: 5, kind: input, shape index: {}]   ;;  %s3350_s6 = inlined_call_operand.vmem [shape: f32[2,1,32], index: 6, kind: input, shape index: {}]   ;;  %s3351_s7 = inlined_call_operand.vmem [shape: f32[2,1,32], index: 7, kind: input, shape index: {}]   ;;  %s3352_s8 = inlined_call_operand.vmem [shape: bf16[2,32,64], index: 8, kind: input, shape index: {}]   ;;  %s3353_s9 = inlined_call_operand.vmem [shape: f32[2,1,64], index: 9, kind: input, shape index: {}]   ;;  %s3354_s10 = inlined_call_operand.vmem [shape: bf16[2,64,32], index: 10, kind: input, shape index: {}]   ;;  %s3355_s11 = inlined_call_operand.vmem [shape: f32[2,1,32], index: 11, kind: input, shape index: {}]   ;;  %s3356_s12 = inlined_call_operand.vmem [shape: f32[2,1,32], index: 12, kind: input, shape index: {}]   ;;  %s3357_s13 = inlined_call_operand.vmem [shape: f32[2,1,32], index: 13, kind: input, shape index: {}]   ;;  %s3358_s14 = inlined_call_operand.hbm [shape: f32[2,1,32], index: 14, kind: output, shape index: {}]  }
   0x1   :  { %3373 = sst [smem:[#allocation5_spill]] %s3344_s0 }
   0x2   :  { %3374 = sst [smem:[#allocation6_spill]] %s3345_s1 }
   0x3   :  { %3375 = sst [smem:[#allocation7_spill]] %s3346_s2 }
   0x4   :  { %3376 = sst [smem:[#allocation8_spill]] %s3347_s3 }
   0x5   :  { %19 = vsyncpa [#allocation3], 0 }
   0x6   :  { %21 = vsyncpa [#allocation3 + $0x1], 0  ;;  %s2898_s29 = smov 0   ;;  %s2900_s30 = smov 0  }
   0x7   :  { %s2902_s15 = smov 0   ;;  %s2904_s16 = smov 0  }
   0x8 LB: > { %s2919_s17 = sadd.s32 4294967295, %s2804_s16   ;;  %s2289_s18 = sadd.s32 4294967294, %s2804_s16   ;;  %s2804_s16 = sphi %s2904_s16, %s3400_s16   ;;  %s2800_s15 = sphi %s2902_s15, %s3399_s15   ;;  %s2796_s30 = sphi %s2900_s30, %s3398_s30   ;;  %s2792_s29 = sphi %s2898_s29, %s3397_s29  }
   0x9   : > { %s2923_s19 = sadd.s32 1, %s2804_s16   ;;  %s338_s20 = sadd.s32 1, %s2800_s15 }
   0xa   : > { %s335_s21 = ssub.s32 %s2804_s16, %s2923_s19  ;;  %p348_p0 = scmp.ne.s32.totalorder %s2800_s15, %s2796_s30 }
   0xb   : > { %p336_p1 = scmp.eq.s32.totalorder %s335_s21, 0  ;;  %p349_p2 = scmp.eq.s32.totalorder %s2919_s17, 1 }
   0xc   : > { %p354_p3 = scmp.ne.s32.totalorder %s2796_s30, %s2792_s29  ;;  %p355_p4 = scmp.eq.s32.totalorder %s2289_s18, 1 }
   0xd   : > { %s2934_s22 = scalar_select %p336_p1, %s2800_s15, %s338_s20  }
   0xe   : > { %p2936_p5 = por %p349_p2, %p348_p0  ;;  %p2940_p6 = por %p355_p4, %p354_p3 }
   0xf   : > { %p2292_p7 = scmp.ge.s32.totalorder %s2804_s16, 1  ;;  %p422_p8 = scmp.lt.s32.totalorder %s2804_s16, 3 }
  0x11   : > { %p423_p9 = pnand %p2292_p7, %p422_p8 }
  0x12   : > { %s3379_s2 = sld [smem:[#allocation7_spill]] (!%p423_p9)  ;;  %p469_p10 = scmp.lt.s32.totalorder (!%p423_p9), %s2919_s17, 1 }
  0x13   : > { %426 = sbr.rel (%p423_p9) target bundleno = 5019 (0x139b), region = 76  ;;  %s3380_s0 = sld [smem:[#allocation5_spill]] (!%p423_p9) }
  0x14   : > { %s3381_s3 = sld [smem:[#allocation8_spill]] (!%p423_p9)  ;;  %s3368_s21 = smov (!%p423_p9), 96  }
  0x15   : > { %s3361_s25 = smov (!%p423_p9), 120   ;;  %s3360_s27 = smov (!%p423_p9), 112  }
  0x16   : > { %s3367_s28 = smov (!%p423_p9), 72   ;;  %s3382_s1 = sld [smem:[#allocation6_spill]] (!%p423_p9) }
  0x18   : > { %v2677_v0 = vld [vmem:[%s3379_s2 + $0x8] sm:$0xff]   ;;  %v2806_v1 = vmov 0.0   ;;  %v2678_v2 = vld [vmem:[%s3379_s2] sm:$0xff]   ;;  %vm2807_vm0 = vmmov 0   ;;  %s2961_s18 = scalar_select %p469_p10, %s2919_s17, 1  ;;  %vm505_vm1 = vcmask 261120   ;;  %v751_v23 = vlaneseq }
  0x19   : > { %2449 = vmatprep.subr.bf16.mxu1 %v2806_v1  ;;  %2463 = vmatprep.subr.bf16.mxu0 %v2806_v1  ;;  %vm553_vm2 = vcmask 64512   ;;  %vm810_vm3 = vcmask 1043456   ;;  %vm1014_vm4 = vcmask 130048   ;;  %vm1016_vm5 = vcmask 195584  }
  0x1a   : > { %2450 = vmatpush3.bf16.msra.mxu1 %v2677_v0  ;;  %2453 = vmatprep.mubr.msk.bf16.mxu1 %vm2807_vm0, %v2806_v1  ;;  %s2293_s20 = sshll.u32 %s2961_s18, 3  ;;  %v2295_v5 = vld [vmem:[%s3381_s3] ss:$0 sm:$0xff]  ;;  %v752_v26 = vshrl.u32 %v751_v23, 7  ;;  %vm1232_vm6 = vcmask 523264   ;;  %vm2203_vm7 = vcmask 57344  }
  0x1b   : > { %2451 = vmatprep.subr.bf16.mxu1 %v2806_v1  ;;  %2465 = vmatprep.mubr.msk.bf16.mxu0 %vm2807_vm0, %v2806_v1  ;;  %s472_s26 = scalar_lea.vmem %s3380_s0, %s2293_s20  ;;  %s3359_s20 = smov 80   ;;  %vm2210_vm8 = vcmask 253952  }
  0x1c   : > { %v2968_v3 = vld [vmem:[%s472_s26] sm:$0xff]  ;;  %s3372_s26 = smov 88   ;;  %v753_v28 = vsub.s32 0, %v752_v26  ;;  %s3387_s0 = smov 104  }
  0x1d   : > { %v481_v4 = vpack.c.bf16 %v2968_v3, %v2968_v3 }
  0x1e   : > { %2452 = vmatpush3.bf16.msra.mxu1 %v2678_v2 }
  0x1f   : > { %2457 = vmatprep.subr.bf16.mxu1 %v2806_v1 }
  0x21   : > { %2454 = vmatmul.mubr.msk.bf16.vlgmr.msra.gmra.mxu1 %vm505_vm1, %v481_v4 }
  0x22   : > { %2459 = vmatprep.mubr.msk.bf16.mxu1 %vm2807_vm0, %v2806_v1 }
  0xe1   : > { %v543_v6 = vpop.f32.mrf.mxu1 }
  0xe2   : > { %v544_v7 = vadd.f32 %v2295_v5, %v543_v6 }
  0xe3   : > { %v2455_v8 = vpop.f32.mrf.mxu1 }
  0xe4   : > { %v2978_v9 = vpack.c.bf16 %v544_v7, %v544_v7 }
  0xe5   : > { %v546_v10 = vpop.f32.mrf.mxu1 }
  0xe6   : > { %652 = vrot.lane.b32.xlu1 %v2978_v9, %s3359_s20  ;;  %551 = vrot.lane.b32.xlu0 %v2978_v9, %s3368_s21  ;;  %s3362_s20 = smov 104   ;;  %s3371_s21 = smov 8  }
  0xe7   : > { %v2456_v11 = vpop.f32.mrf.mxu1 }
  0xea   : > { %600 = vrot.lane.b32.xlu1 %v2978_v9, %s3361_s25  ;;  %602 = vrot.lane.b32.xlu0 %v2978_v9, %s3372_s26  ;;  %s3363_s25 = smov 64   ;;  %s3390_s26 = smov 56  }
  0xee   : > { %650 = vrot.lane.b32.xlu1 %v2978_v9, %s3360_s27  ;;  %702 = vrot.lane.b32.xlu0 %v2978_v9, %s3367_s28  ;;  %s3365_s27 = smov 48   ;;  %s3369_s28 = smov 24  }
  0xf2   : > { %700 = vrot.lane.b32.xlu0 %v2978_v9, %s3362_s20  ;;  %s3019_s20 = scalar_lea.vmem %s3382_s1, %s2961_s18  ;;  %s3366_s18 = smov 56  }
  0xf3   : > { %v478_v24 = vld [vmem:[%s3019_s20] sm:$0x1]  ;;  %s3388_s1 = smov 120  }
  0xf4   : > { %v2294_v25 = vadd.f32 -1.0, %v478_v24 }
  0xf6   : > { %v480_v27 = vmul.f32 1e+09, %v2294_v25 }
  0xf8   : > { %v3022_v29 = vrot.slane %v480_v27, %v753_v28 }
 0x158   : > { %v552_v12 = vpop.permute.xlu0 %551  ;;  %v653_v14 = vpop.permute.xlu1 %652 }
 0x159   : > { %v558_v13 = vsel %vm553_vm2, %v552_v12, 0  ;;  %v658_v17 = vsel %vm553_vm2, %v653_v14, 0 }
 0x15a   : > { %2458 = vmatpush3.bf16.xpose.msra.mxu1 %v558_v13 }
 0x15b   : > { %2469 = vmatprep.subr.bf16.mxu1 %v2806_v1 }
 0x15c   : > { %v603_v15 = vpop.permute.xlu0 %602  ;;  %v601_v18 = vpop.permute.xlu1 %600 }
 0x15d   : > { %v608_v16 = vsel %vm553_vm2, %v603_v15, 0 }
 0x15e   : > { %2464 = vmatpush3.bf16.xpose.msra.mxu0 %v608_v16 }
 0x15f   : > { %2475 = vmatprep.subr.bf16.mxu0 %v2806_v1 }
 0x160   : > { %v703_v19 = vpop.permute.xlu0 %702  ;;  %v651_v21 = vpop.permute.xlu1 %650 }
 0x161   : > { %2460 = vmatmul.mubr.msk.bf16.vlgmr.msra.gmra.mxu1 %vm553_vm2, %v2978_v9  ;;  %v708_v20 = vsel %vm553_vm2, %v703_v19, 0 }
 0x162   : > { %2470 = vmatpush3.bf16.xpose.msra.mxu1 %v658_v17  ;;  %2471 = vmatprep.mubr.msk.bf16.mxu1 %vm2807_vm0, %v2806_v1 }
 0x163   : > { %2481 = vmatprep.subr.bf16.mxu1 %v2806_v1 }
 0x164   : > { %v701_v22 = vpop.permute.xlu0 %700 }
 0x165   : > { %2466 = vmatmul.mubr.msk.bf16.vlgmr.msra.gmra.mxu0 %vm553_vm2, %v601_v18 }
 0x166   : > { %2476 = vmatpush3.bf16.xpose.msra.mxu0 %v708_v20  ;;  %2477 = vmatprep.mubr.msk.bf16.mxu0 %vm2807_vm0, %v2806_v1 }
 0x167   : > { %2487 = vmatprep.subr.bf16.mxu0 %v2806_v1 }
 0x169   : > { %2472 = vmatmul.mubr.msk.bf16.vlgmr.msra.gmra.mxu1 %vm553_vm2, %v651_v21 }
 0x16a   : > { %2483 = vmatprep.mubr.msk.bf16.mxu1 %vm2807_vm0, %v2806_v1 }
 0x16d   : > { %2478 = vmatmul.mubr.msk.bf16.vlgmr.msra.gmra.mxu0 %vm553_vm2, %v701_v22 }
 0x16e   : > { %2489 = vmatprep.mubr.msk.bf16.mxu0 %vm2807_vm0, %v2806_v1 }
 0x221   : > { %v594_v30 = vpop.f32.mrf.mxu1 }
 0x222   : > { %v756_v31 = vadd.f32 %v3022_v29, %v594_v30 }
 0x223   : > { %v2461_v32 = vpop.f32.mrf.mxu1 }
 0x224   : > { %v760_v33 = vsel %vm553_vm2, %v756_v31, -inf }
 0x225   : > { %v644_v34 = vpop.f32.mrf.mxu0  ;;  %761 = vmax.xlane.f32.xlu1 %v760_v33  ;;  %v597_v35 = vpop.f32.mrf.mxu1 }
 0x226   : > { %v757_v36 = vadd.f32 %v3022_v29, %v644_v34 }
 0x227   : > { %v2462_v37 = vpop.f32.mrf.mxu1  ;;  %v2467_v38 = vpop.f32.mrf.mxu0 }
 0x228   : > { %v763_v39 = vsel %vm553_vm2, %v757_v36, -inf  ;;  %v2679_v37 = vld [vmem:[%s3348_s4 + $0x8] sm:$0xff]   ;;  %v2680_v38 = vld [vmem:[%s3348_s4] sm:$0xff]  }
 0x229   : > { %764 = vmax.xlane.f32.xlu0 %v763_v39  ;;  %v647_v40 = vpop.f32.mrf.mxu0  ;;  %v694_v41 = vpop.f32.mrf.mxu1 }
 0x22a   : > { %v758_v42 = vadd.f32 %v3022_v29, %v694_v41 }
 0x22b   : > { %v2468_v43 = vpop.f32.mrf.mxu0  ;;  %v2473_v44 = vpop.f32.mrf.mxu1 }
 0x22c   : > { %v766_v45 = vsel %vm553_vm2, %v758_v42, -inf }
 0x22d   : > { %v744_v46 = vpop.f32.mrf.mxu0  ;;  %767 = vmax.xlane.f32.xlu0 %v766_v45  ;;  %v697_v47 = vpop.f32.mrf.mxu1 }
 0x22e   : > { %v759_v48 = vadd.f32 %v3022_v29, %v744_v46 }
 0x22f   : > { %v2474_v49 = vpop.f32.mrf.mxu1  ;;  %v2479_v50 = vpop.f32.mrf.mxu0 }
 0x230   : > { %v769_v51 = vsel %vm553_vm2, %v759_v48, -inf }
 0x231   : > { %v747_v52 = vpop.f32.mrf.mxu0  ;;  %770 = vmax.xlane.f32.xlu1 %v769_v51 }
 0x233   : > { %v2480_v53 = vpop.f32.mrf.mxu0 }
 0x242   : > { %855 = vrot.lane.b32.xlu1 %v2978_v9, %s3366_s18  ;;  %s3384_s18 = smov 96  }
 0x243   : > { %805 = vrot.lane.b32.xlu0 %v2978_v9, %s3363_s25  ;;  %s3364_s25 = smov 40  }
 0x2ae   : > { %v762_v54 = vpop.xlane.xlu1 %761 }
 0x2af   : > { %v772_v55 = vsub.f32 %v756_v31, %v762_v54 }
 0x2b1   : > { %v776_v56 = vmul.f32 1.442695, %v772_v55 }
 0x2b2   : > { %v765_v57 = vpop.xlane.xlu0 %764 }
 0x2b3   : > { %2697 = vpow2.f32 %v776_v56  ;;  %v773_v58 = vsub.f32 %v757_v36, %v765_v57 }
 0x2b5   : > { %v778_v59 = vmul.f32 1.442695, %v773_v58 }
 0x2b6   : > { %v768_v60 = vpop.xlane.xlu0 %767 }
 0x2b7   : > { %2699 = vpow2.f32 %v778_v59  ;;  %v774_v61 = vsub.f32 %v758_v42, %v768_v60 }
 0x2b9   : > { %v780_v62 = vmul.f32 1.442695, %v774_v61 }
 0x2ba   : > { %v771_v63 = vpop.xlane.xlu1 %770  ;;  %v806_v0 = vpop.permute.xlu0 %805 }
 0x2bb   : > { %2701 = vpow2.f32 %v780_v62  ;;  %v775_v2 = vsub.f32 %v759_v48, %v771_v63  ;;  %v812_v4 = vsel %vm810_vm3, %v806_v0, 0  ;;  %v2307_v62 = vld [vmem:[%s3349_s5] ss:$0 sm:$0xff] }
 0x2bc   : > { %2482 = vmatpush3.bf16.msra.mxu1 %v812_v4 }
 0x2bd   : > { %v782_v5 = vmul.f32 1.442695, %v775_v2  ;;  %2493 = vmatprep.subr.bf16.mxu1 %v2806_v1 }
 0x2be   : > { %v856_v6 = vpop.permute.xlu1 %855 }
 0x2bf   : > { %2703 = vpow2.f32 %v782_v5  ;;  %v861_v7 = vsel %vm810_vm3, %v856_v6, 0 }
 0x2c0   : > { %v2698_v8 = vpop.eup %2697  ;;  %2488 = vmatpush3.bf16.msra.mxu0 %v861_v7 }
 0x2c1   : > { %v784_v10 = vsel %vm553_vm2, %v2698_v8, 0.0  ;;  %2499 = vmatprep.subr.bf16.mxu0 %v2806_v1 }
 0x2c2   : > { %785 = vadd.xlane.f32.xlu0 %v784_v10 }
 0x2c4   : > { %v2700_v11 = vpop.eup %2699 }
 0x2c5   : > { %v787_v12 = vsel %vm553_vm2, %v2700_v11, 0.0 }
 0x2c6   : > { %788 = vadd.xlane.f32.xlu1 %v787_v12 }
 0x2c8   : > { %v2702_v13 = vpop.eup %2701 }
 0x2c9   : > { %v790_v14 = vsel %vm553_vm2, %v2702_v13, 0.0 }
 0x2ca   : > { %791 = vadd.xlane.f32.xlu0 %v790_v14  ;;  %v2681_v14 = vld [vmem:[%s3352_s8 + $0x8] sm:$0xff]  }
 0x2cc   : > { %v2704_v15 = vpop.eup %2703 }
 0x2cd   : > { %v793_v16 = vsel %vm553_vm2, %v2704_v15, 0.0 }
 0x2ce   : > { %794 = vadd.xlane.f32.xlu1 %v793_v16 }
 0x2df   : > { %904 = vrot.lane.b32.xlu1 %v2978_v9, %s3365_s27  ;;  %s3386_s27 = smov 80  }
 0x2e0   : > { %953 = vrot.lane.b32.xlu0 %v2978_v9, %s3364_s25  ;;  %s3370_s25 = smov 16  }
 0x34b   : > { %v786_v17 = vpop.xlane.xlu0 %785 }
 0x34c   : > { %2705 = vrcp.f32 %v786_v17 }
 0x34f   : > { %v789_v18 = vpop.xlane.xlu1 %788 }
 0x350   : > { %2707 = vrcp.f32 %v789_v18 }
 0x353   : > { %v792_v19 = vpop.xlane.xlu0 %791 }
 0x354   : > { %2709 = vrcp.f32 %v792_v19  ;;  %v2311_v19 = vld [vmem:[%s3350_s6] ss:$0 sm:$0xff] }
 0x357   : > { %v795_v20 = vpop.xlane.xlu1 %794  ;;  %v954_v28 = vpop.permute.xlu0 %953 }
 0x358   : > { %2711 = vrcp.f32 %v795_v20  ;;  %v959_v31 = vsel %vm810_vm3, %v954_v28, 0  ;;  %v2686_v28 = vld [vmem:[%s3354_s10] sm:$0xff]  }
 0x359   : > { %v2706_v21 = vpop.eup %2705 }
 0x35a   : > { %v800_v22 = vmul.f32 %v2706_v21, %v2698_v8  ;;  %v2312_v21 = vld [vmem:[%s3351_s7] ss:$0 sm:$0xff] }
 0x35b   : > { %v905_v23 = vpop.permute.xlu1 %904 }
 0x35c   : > { %v910_v24 = vsel %vm810_vm3, %v905_v23, 0  ;;  %v804_v25 = vpack.c.bf16 %v800_v22, %v800_v22 }
 0x35d   : > { %v2708_v26 = vpop.eup %2707 }
 0x35e   : > { %2484 = vmatmul.mubr.msk.bf16.vlgmr.msra.gmra.mxu1 %vm553_vm2, %v804_v25  ;;  %v801_v27 = vmul.f32 %v2708_v26, %v2700_v11  ;;  %v2683_v25 = vld [vmem:[%s3354_s10 + $0x18] sm:$0xff]   ;;  %v2684_v26 = vld [vmem:[%s3354_s10 + $0x10] sm:$0xff]  }
 0x35f   : > { %2494 = vmatpush3.bf16.msra.mxu1 %v910_v24  ;;  %2495 = vmatprep.mubr.msk.bf16.mxu1 %vm2807_vm0, %v2806_v1 }
 0x360   : > { %v854_v9 = vpack.c.bf16 %v801_v27, %v801_v27  ;;  %2505 = vmatprep.subr.bf16.mxu1 %v2806_v1  ;;  %v2685_v27 = vld [vmem:[%s3354_s10 + $0x8] sm:$0xff]  }
 0x361   : > { %v2710_v30 = vpop.eup %2709 }
 0x362   : > { %2490 = vmatmul.mubr.msk.bf16.vlgmr.msra.gmra.mxu0 %vm553_vm2, %v854_v9  ;;  %v802_v32 = vmul.f32 %v2710_v30, %v2702_v13  ;;  %v2313_v9 = vld [vmem:[%s3353_s9] ss:$0 sm:$0xff] }
 0x363   : > { %2500 = vmatpush3.bf16.msra.mxu0 %v959_v31  ;;  %2501 = vmatprep.mubr.msk.bf16.mxu0 %vm2807_vm0, %v2806_v1 }
 0x364   : > { %v903_v33 = vpack.c.bf16 %v802_v32, %v802_v32  ;;  %2513 = vmatprep.subr.bf16.mxu0 %v2806_v1 }
 0x365   : > { %v2712_v34 = vpop.eup %2711 }
 0x366   : > { %2496 = vmatmul.mubr.msk.bf16.vlgmr.msra.gmra.mxu1 %vm553_vm2, %v903_v33  ;;  %v803_v35 = vmul.f32 %v2712_v34, %v2704_v15 }
 0x367   : > { %2509 = vmatprep.mubr.msk.bf16.mxu1 %vm2807_vm0, %v2806_v1  ;;  %2506 = vmatpush3.bf16.msra.mxu1 %v2679_v37 }
 0x368   : > { %v952_v36 = vpack.c.bf16 %v803_v35, %v803_v35  ;;  %2507 = vmatprep.subr.bf16.mxu1 %v2806_v1 }
 0x36a   : > { %2502 = vmatmul.mubr.msk.bf16.vlgmr.msra.gmra.mxu0 %vm553_vm2, %v952_v36 }
 0x36b   : > { %2517 = vmatprep.mubr.msk.bf16.mxu0 %vm2807_vm0, %v2806_v1  ;;  %2508 = vmatpush3.bf16.msra.mxu1 %v2680_v38 }
 0x36c   : > { %2521 = vmatprep.subr.bf16.mxu1 %v2806_v1  ;;  %2514 = vmatpush3.bf16.msra.mxu0 %v2681_v14 }
 0x36d   : > { %2515 = vmatprep.subr.bf16.mxu0 %v2806_v1 }
 0x41e   : > { %v848_v39 = vpop.f32.mrf.mxu1 }
 0x420   : > { %v2485_v40 = vpop.f32.mrf.mxu1 }
 0x422   : > { %v851_v41 = vpop.f32.mrf.mxu1  ;;  %v897_v42 = vpop.f32.mrf.mxu0 }
 0x423   : > { %1002 = vrot.lane.b32.xlu1 %v897_v42, %s3371_s21  ;;  %s3389_s21 = smov 112  }
 0x424   : > { %v2486_v43 = vpop.f32.mrf.mxu1  ;;  %v2491_v44 = vpop.f32.mrf.mxu0 }
 0x426   : > { %v900_v45 = vpop.f32.mrf.mxu0  ;;  %v946_v46 = vpop.f32.mrf.mxu1 }
 0x427   : > { %1006 = vrot.lane.b32.xlu0 %v946_v46, %s3370_s25  ;;  %v2317_v45 = vld [vmem:[%s3355_s11] ss:$0 sm:$0xff]  ;;  %s3385_s25 = smov 72  }
 0x428   : > { %v2492_v47 = vpop.f32.mrf.mxu0  ;;  %v2497_v48 = vpop.f32.mrf.mxu1 }
 0x42a   : > { %v949_v49 = vpop.f32.mrf.mxu1  ;;  %v995_v50 = vpop.f32.mrf.mxu0 }
 0x42b   : > { %1010 = vrot.lane.b32.xlu1 %v995_v50, %s3369_s28  ;;  %s3383_s28 = smov 88  }
 0x42c   : > { %v2498_v51 = vpop.f32.mrf.mxu1  ;;  %v2503_v52 = vpop.f32.mrf.mxu0 }
 0x42e   : > { %v998_v53 = vpop.f32.mrf.mxu0 }
 0x430   : > { %v2504_v54 = vpop.f32.mrf.mxu0 }
 0x495   : > { %v1003_v55 = vpop.permute.xlu1 %1002 }
 0x496   : > { %v1013_v57 = vsel %vm553_vm2, %v848_v39, %v1003_v55 }
 0x499   : > { %v1007_v56 = vpop.permute.xlu0 %1006 }
 0x49a   : > { %v1015_v58 = vsel %vm1014_vm4, %v1013_v57, %v1007_v56 }
 0x49d   : > { %v1011_v59 = vpop.permute.xlu1 %1010 }
 0x49e   : > { %v1017_v60 = vsel %vm1016_vm5, %v1015_v58, %v1011_v59  ;;  %v2687_v58 = vld [vmem:[%s3379_s2 + $0x18] sm:$0xff]   ;;  %v2688_v59 = vld [vmem:[%s3379_s2 + $0x10] sm:$0xff]  }
 0x49f   : > { %v1018_v61 = vpack.c.bf16 %v1017_v60, %v1017_v60 }
 0x4a1   : > { %2510 = vmatmul.mubr.msk.bf16.vlgmr.msra.gmra.mxu1 %vm505_vm1, %v1018_v61 }
 0x4a2   : > { %2529 = vmatprep.mubr.msk.bf16.mxu1 %vm2807_vm0, %v2806_v1  ;;  %2522 = vmatpush3.bf16.msra.mxu1 %v2683_v25 }
 0x4a3   : > { %2523 = vmatprep.subr.bf16.mxu1 %v2806_v1 }
 0x4a6   : > { %2524 = vmatpush3.bf16.msra.mxu1 %v2684_v26 }
 0x4a7   : > { %2525 = vmatprep.subr.bf16.mxu1 %v2806_v1 }
 0x4aa   : > { %2526 = vmatpush3.bf16.msra.mxu1 %v2685_v27 }
 0x4ab   : > { %2527 = vmatprep.subr.bf16.mxu1 %v2806_v1 }
 0x4ae   : > { %2528 = vmatpush3.bf16.msra.mxu1 %v2686_v28 }
 0x4af   : > { %2547 = vmatprep.subr.bf16.mxu1 %v2806_v1 }
 0x561   : > { %v1079_v63 = vpop.f32.mrf.mxu1 }
 0x562   : > { %v1080_v0 = vadd.f32 %v2307_v62, %v1079_v63 }
 0x563   : > { %v2511_v2 = vpop.f32.mrf.mxu1 }
 0x564   : > { %v1085_v4 = vadd.f32 %v1080_v0, %v2968_v3  ;;  %v2682_v3 = vld [vmem:[%s3352_s8] sm:$0xff]  }
 0x565   : > { %v1082_v5 = vpop.f32.mrf.mxu1  ;;  %2516 = vmatpush3.bf16.msra.mxu0 %v2682_v3  ;;  %v2323_v0 = vld [vmem:[%s3356_s12] ss:$0 sm:$0xff] }
 0x566   : > { %v1088_v6 = vsel %vm505_vm1, %v1085_v4, 0.0  ;;  %2533 = vmatprep.subr.bf16.mxu0 %v2806_v1 }
 0x567   : > { %1089 = vadd.xlane.f32.xlu0 %v1088_v6  ;;  %v2512_v7 = vpop.f32.mrf.mxu1 }
 0x5f0   : > { %v1090_v8 = vpop.xlane.xlu0 %1089 }
 0x5f1   : > { %v1092_v10 = vmul.f32 0.03125, %v1090_v8  ;;  %v2330_v8 = vld [vmem:[%s3381_s3 + $0x1] ss:$0 sm:$0xff] }
 0x5f3   : > { %v1093_v11 = vsub.f32 %v1085_v4, %v1092_v10  ;;  %v2324_v4 = vld [vmem:[%s3357_s13] ss:$0 sm:$0xff] }
 0x5f5   : > { %v1094_v12 = vmul.f32 %v1093_v11, %v1093_v11 }
 0x5f7   : > { %v1095_v13 = vsel %vm505_vm1, %v1094_v12, 0.0 }
 0x5f8   : > { %1096 = vadd.xlane.f32.xlu1 %v1095_v13 }
 0x681   : > { %v1097_v15 = vpop.xlane.xlu1 %1096 }
 0x682   : > { %v1098_v16 = vmul.f32 0.03125, %v1097_v15 }
 0x684   : > { %v1099_v17 = vadd.f32 1e-12, %v1098_v16 }
 0x686   : > { %2713 = vrsqrt.f32 %v1099_v17 }
 0x693   : > { %v2714_v18 = vpop.eup %2713 }
 0x694   : > { %v1101_v20 = vmul.f32 %v2714_v18, %v1093_v11 }
 0x696   : > { %v1108_v22 = vmul.f32 %v2311_v19, %v1101_v20 }
 0x698   : > { %v1115_v23 = vadd.f32 %v2312_v21, %v1108_v22 }
 0x69a   : > { %v1116_v24 = vpack.c.bf16 %v1115_v23, %v1115_v23 }
 0x69c   : > { %2518 = vmatmul.mubr.msk.bf16.vlgmr.msra.gmra.mxu0 %vm505_vm1, %v1116_v24 }
 0x69d   : > { %2537 = vmatprep.mubr.msk.bf16.mxu0 %vm2807_vm0, %v2806_v1  ;;  %2534 = vmatpush3.bf16.msra.mxu0 %v2687_v58 }
 0x69e   : > { %2535 = vmatprep.subr.bf16.mxu0 %v2806_v1 }
 0x6a1   : > { %2536 = vmatpush3.bf16.msra.mxu0 %v2688_v59 }
 0x6a2   : > { %2541 = vmatprep.subr.bf16.mxu0 %v2806_v1 }
 0x75c   : > { %v1177_v30 = vpop.f32.mrf.mxu0 }
 0x75d   : > { %v1178_v31 = vadd.f32 %v2313_v9, %v1177_v30 }
 0x75e   : > { %v2519_v32 = vpop.f32.mrf.mxu0 }
 0x75f   : > { %v1184_v33 = vmul.f32 0.044715, %v1178_v31  ;;  %v1183_v41 = vmul.f32 0.5, %v1178_v31 }
 0x760   : > { %v1180_v34 = vpop.f32.mrf.mxu0 }
 0x761   : > { %v1185_v35 = vmul.f32 %v1184_v33, %v1178_v31 }
 0x762   : > { %v2520_v36 = vpop.f32.mrf.mxu0 }
 0x763   : > { %v1186_v37 = vmul.f32 %v1185_v35, %v1178_v31 }
 0x765   : > { %v1187_v38 = vadd.f32 %v1186_v37, %v1178_v31 }
 0x767   : > { %v1188_v39 = vmul.f32 0.7978846, %v1187_v38 }
 0x769   : > { %2715 = vtanh.f32 %v1188_v39 }
 0x776   : > { %v2716_v40 = vpop.eup %2715 }
 0x777   : > { %v1190_v42 = vadd.f32 1.0, %v2716_v40 }
 0x779   : > { %v1191_v43 = vmul.f32 %v1190_v42, %v1183_v41 }
 0x77b   : > { %v1192_v44 = vpack.c.bf16 %v1191_v43, %v1191_v43 }
 0x77d   : > { %2530 = vmatmul.mubr.msk.bf16.vlgmr.msra.gmra.mxu1 %vm1232_vm6, %v1192_v44 }
 0x77e   : > { %2549 = vmatprep.mubr.msk.bf16.mxu1 %vm2807_vm0, %v2806_v1 }
 0x83d   : > { %v1270_v46 = vpop.f32.mrf.mxu1 }
 0x83e   : > { %v1271_v47 = vadd.f32 %v2317_v45, %v1270_v46 }
 0x83f   : > { %v2531_v48 = vpop.f32.mrf.mxu1 }
 0x840   : > { %v1276_v49 = vadd.f32 %v1271_v47, %v1115_v23 }
 0x841   : > { %v1273_v50 = vpop.f32.mrf.mxu1 }
 0x842   : > { %v1279_v51 = vsel %vm505_vm1, %v1276_v49, 0.0 }
 0x843   : > { %1280 = vadd.xlane.f32.xlu0 %v1279_v51  ;;  %v2532_v52 = vpop.f32.mrf.mxu1 }
 0x8cc   : > { %v1281_v53 = vpop.xlane.xlu0 %1280 }
 0x8cd   : > { %v1282_v54 = vmul.f32 0.03125, %v1281_v53 }
 0x8cf   : > { %v1283_v55 = vsub.f32 %v1276_v49, %v1282_v54 }
 0x8d1   : > { %v1284_v56 = vmul.f32 %v1283_v55, %v1283_v55 }
 0x8d3   : > { %v1285_v57 = vsel %vm505_vm1, %v1284_v56, 0.0 }
 0x8d4   : > { %1286 = vadd.xlane.f32.xlu0 %v1285_v57 }
 0x95d   : > { %v1287_v60 = vpop.xlane.xlu0 %1286 }
 0x95e   : > { %v1288_v61 = vmul.f32 0.03125, %v1287_v60 }
 0x960   : > { %v1289_v62 = vadd.f32 1e-12, %v1288_v61 }
 0x962   : > { %2717 = vrsqrt.f32 %v1289_v62 }
 0x96f   : > { %v2718_v63 = vpop.eup %2717 }
 0x970   : > { %v1291_v2 = vmul.f32 %v2718_v63, %v1283_v55 }
 0x972   : > { %v1298_v5 = vmul.f32 %v2323_v0, %v1291_v2 }
 0x974   : > { %v3145_v6 = vadd.f32 %v2324_v4, %v1298_v5 }
 0x976   : > { %v1306_v7 = vpack.c.bf16 %v3145_v6, %v3145_v6 }
 0x978   : > { %2538 = vmatmul.mubr.msk.bf16.vlgmr.msra.gmra.mxu0 %vm505_vm1, %v1306_v7 }
 0x979   : > { %2543 = vmatprep.mubr.msk.bf16.mxu0 %vm2807_vm0, %v2806_v1 }
 0xa38   : > { %v1369_v10 = vpop.f32.mrf.mxu0 }
 0xa39   : > { %v1370_v11 = vadd.f32 %v2330_v8, %v1369_v10 }
 0xa3a   : > { %v2539_v12 = vpop.f32.mrf.mxu0 }
 0xa3b   : > { %v3155_v13 = vpack.c.bf16 %v1370_v11, %v1370_v11 }
 0xa3c   : > { %v1372_v14 = vpop.f32.mrf.mxu0 }
 0xa3d   : > { %1427 = vrot.lane.b32.xlu0 %v3155_v13, %s3383_s28  ;;  %1377 = vrot.lane.b32.xlu1 %v3155_v13, %s3384_s18  ;;  %s3391_s28 = smov 64   ;;  %s3392_s18 = smov 48  }
 0xa3e   : > { %v2540_v3 = vpop.f32.mrf.mxu0 }
 0xa41   : > { %1527 = vrot.lane.b32.xlu0 %v3155_v13, %s3385_s25  ;;  %1477 = vrot.lane.b32.xlu1 %v3155_v13, %s3386_s27  ;;  %s3393_s25 = smov 40  }
 0xa45   : > { %1525 = vrot.lane.b32.xlu0 %v3155_v13, %s3387_s0  ;;  %1425 = vrot.lane.b32.xlu1 %v3155_v13, %s3388_s1  ;;  %s2384_s0 = sshll.u32 %s2919_s17, 4  ;;  %s2822_s17 = smov [#allocation2]  }
 0xa46   : > { %s2748_s2 = sshll.u32 %s2822_s17, 4  ;;  %s2749_s2 = int_to_ptr.vmem [resolvable:$false] %s2748_s2 }
 0xa47   : > { %s2750_s3 = scalar_lea.vmem %s2749_s2, 32 }
 0xa49   : > { %1475 = vrot.lane.b32.xlu1 %v3155_v13, %s3389_s21 }
 0xaaf   : > { %v1428_v15 = vpop.permute.xlu0 %1427  ;;  %v1378_v16 = vpop.permute.xlu1 %1377 }
 0xab0   : > { %v1433_v17 = vsel %vm553_vm2, %v1428_v15, 0  ;;  %v1383_v18 = vsel %vm553_vm2, %v1378_v16, 0 }
 0xab1   : > { %2542 = vmatpush3.bf16.xpose.msra.mxu0 %v1383_v18  ;;  %2548 = vmatpush3.bf16.xpose.msra.mxu1 %v1433_v17 }
 0xab2   : > { %2553 = vmatprep.subr.bf16.mxu0 %v2806_v1  ;;  %2559 = vmatprep.subr.bf16.mxu1 %v2806_v1 }
 0xab3   : > { %v1478_v19 = vpop.permute.xlu1 %1477  ;;  %v1528_v20 = vpop.permute.xlu0 %1527 }
 0xab4   : > { %v1533_v22 = vsel %vm553_vm2, %v1528_v20, 0  ;;  %v1483_v23 = vsel %vm553_vm2, %v1478_v19, 0 }
 0xab7   : > { %v1426_v21 = vpop.permute.xlu1 %1425  ;;  %v1526_v24 = vpop.permute.xlu0 %1525 }
 0xab8   : > { %2544 = vmatmul.mubr.msk.bf16.vlgmr.msra.gmra.mxu0 %vm553_vm2, %v3155_v13  ;;  %2550 = vmatmul.mubr.msk.bf16.vlgmr.msra.gmra.mxu1 %vm553_vm2, %v1426_v21 }
 0xab9   : > { %2554 = vmatpush3.bf16.xpose.msra.mxu0 %v1483_v23  ;;  %2560 = vmatpush3.bf16.xpose.msra.mxu1 %v1533_v22 }
 0xaba   : > { %2555 = vmatprep.mubr.msk.bf16.mxu0 %vm2807_vm0, %v2806_v1  ;;  %2561 = vmatprep.mubr.msk.bf16.mxu1 %vm2807_vm0, %v2806_v1 }
 0xabb   : > { %2565 = vmatprep.subr.bf16.mxu0 %v2806_v1  ;;  %2571 = vmatprep.subr.bf16.mxu1 %v2806_v1  ;;  %v1476_v25 = vpop.permute.xlu1 %1475 }
 0xac0   : > { %2556 = vmatmul.mubr.msk.bf16.vlgmr.msra.gmra.mxu0 %vm553_vm2, %v1476_v25  ;;  %2562 = vmatmul.mubr.msk.bf16.vlgmr.msra.gmra.mxu1 %vm553_vm2, %v1526_v24 }
 0xac1   : > { %2567 = vmatprep.mubr.msk.bf16.mxu0 %vm2807_vm0, %v2806_v1  ;;  %2573 = vmatprep.mubr.msk.bf16.mxu1 %vm2807_vm0, %v2806_v1 }
 0xb78   : > { %v1419_v26 = vpop.f32.mrf.mxu0  ;;  %v1469_v27 = vpop.f32.mrf.mxu1 }
 0xb79   : > { %v1575_v28 = vadd.f32 %v1419_v26, %v3022_v29  ;;  %v1576_v9 = vadd.f32 %v1469_v27, %v3022_v29 }
 0xb7a   : > { %v2545_v30 = vpop.f32.mrf.mxu0  ;;  %v2551_v31 = vpop.f32.mrf.mxu1 }
 0xb7b   : > { %v1579_v32 = vsel %vm553_vm2, %v1575_v28, -inf  ;;  %v1582_v33 = vsel %vm553_vm2, %v1576_v9, -inf }
 0xb7c   : > { %1580 = vmax.xlane.f32.xlu1 %v1579_v32  ;;  %v1422_v34 = vpop.f32.mrf.mxu0  ;;  %1583 = vmax.xlane.f32.xlu0 %v1582_v33  ;;  %v1472_v35 = vpop.f32.mrf.mxu1  ;;  %v2689_v32 = vld [vmem:[%s3348_s4 + $0x18] sm:$0xff]   ;;  %v2690_v33 = vld [vmem:[%s3348_s4 + $0x10] sm:$0xff]  }
 0xb7e   : > { %v2546_v36 = vpop.f32.mrf.mxu0  ;;  %v2552_v37 = vpop.f32.mrf.mxu1 }
 0xb80   : > { %v1519_v38 = vpop.f32.mrf.mxu0  ;;  %v1569_v39 = vpop.f32.mrf.mxu1 }
 0xb81   : > { %v1577_v40 = vadd.f32 %v1519_v38, %v3022_v29  ;;  %v1578_v41 = vadd.f32 %v1569_v39, %v3022_v29 }
 0xb82   : > { %v2557_v42 = vpop.f32.mrf.mxu0  ;;  %v2563_v43 = vpop.f32.mrf.mxu1 }
 0xb83   : > { %v1585_v44 = vsel %vm553_vm2, %v1577_v40, -inf  ;;  %v1588_v45 = vsel %vm553_vm2, %v1578_v41, -inf }
 0xb84   : > { %v1522_v46 = vpop.f32.mrf.mxu0  ;;  %1586 = vmax.xlane.f32.xlu0 %v1585_v44  ;;  %1589 = vmax.xlane.f32.xlu1 %v1588_v45  ;;  %v1572_v47 = vpop.f32.mrf.mxu1 }
 0xb86   : > { %v2558_v48 = vpop.f32.mrf.mxu0  ;;  %v2564_v49 = vpop.f32.mrf.mxu1 }
 0xb95   : > { %1673 = vrot.lane.b32.xlu1 %v3155_v13, %s3390_s26  ;;  %s3394_s26 = smov 8  }
 0xb9a   : > { %1624 = vrot.lane.b32.xlu0 %v3155_v13, %s3391_s28  ;;  %s3395_s28 = smov 16  }
 0xc05   : > { %v1581_v50 = vpop.xlane.xlu1 %1580  ;;  %v1584_v29 = vpop.xlane.xlu0 %1583 }
 0xc06   : > { %v1591_v51 = vsub.f32 %v1575_v28, %v1581_v50  ;;  %v1592_v52 = vsub.f32 %v1576_v9, %v1584_v29 }
 0xc08   : > { %v1595_v53 = vmul.f32 1.442695, %v1591_v51  ;;  %v1597_v54 = vmul.f32 1.442695, %v1592_v52 }
 0xc0a   : > { %2719 = vpow2.f32 %v1595_v53 }
 0xc0b   : > { %2721 = vpow2.f32 %v1597_v54 }
 0xc0d   : > { %v1587_v55 = vpop.xlane.xlu0 %1586  ;;  %v1590_v56 = vpop.xlane.xlu1 %1589 }
 0xc0e   : > { %v1593_v57 = vsub.f32 %v1577_v40, %v1587_v55  ;;  %v1594_v58 = vsub.f32 %v1578_v41, %v1590_v56  ;;  %v2347_v56 = vld [vmem:[%s3349_s5 + $0x1] ss:$0 sm:$0xff] }
 0xc10   : > { %v1599_v59 = vmul.f32 1.442695, %v1593_v57  ;;  %v1601_v60 = vmul.f32 1.442695, %v1594_v58 }
 0xc11   : > { %v1625_v61 = vpop.permute.xlu0 %1624  ;;  %v1674_v62 = vpop.permute.xlu1 %1673 }
 0xc12   : > { %2723 = vpow2.f32 %v1599_v59  ;;  %v1630_v63 = vsel %vm810_vm3, %v1625_v61, 0  ;;  %v1679_v0 = vsel %vm810_vm3, %v1674_v62, 0 }
 0xc13   : > { %2725 = vpow2.f32 %v1601_v60  ;;  %2566 = vmatpush3.bf16.msra.mxu0 %v1630_v63  ;;  %2572 = vmatpush3.bf16.msra.mxu1 %v1679_v0 }
 0xc14   : > { %2577 = vmatprep.subr.bf16.mxu0 %v2806_v1  ;;  %2583 = vmatprep.subr.bf16.mxu1 %v2806_v1 }
 0xc17   : > { %v2720_v2 = vpop.eup %2719 }
 0xc18   : > { %v2722_v4 = vpop.eup %2721  ;;  %v1603_v5 = vsel %vm553_vm2, %v2720_v2, 0.0 }
 0xc19   : > { %1604 = vadd.xlane.f32.xlu0 %v1603_v5  ;;  %v1606_v7 = vsel %vm553_vm2, %v2722_v4, 0.0 }
 0xc1a   : > { %1607 = vadd.xlane.f32.xlu1 %v1606_v7 }
 0xc1f   : > { %v2724_v8 = vpop.eup %2723 }
 0xc20   : > { %v2726_v10 = vpop.eup %2725  ;;  %v1609_v11 = vsel %vm553_vm2, %v2724_v8, 0.0 }
 0xc21   : > { %1610 = vadd.xlane.f32.xlu0 %v1609_v11  ;;  %v1612_v12 = vsel %vm553_vm2, %v2726_v10, 0.0 }
 0xc22   : > { %1613 = vadd.xlane.f32.xlu1 %v1612_v12 }
 0xc33   : > { %1722 = vrot.lane.b32.xlu1 %v3155_v13, %s3392_s18  ;;  %s3396_s18 = smov 24  }
 0xc37   : > { %1771 = vrot.lane.b32.xlu0 %v3155_v13, %s3393_s25 }
 0xca2   : > { %v1605_v14 = vpop.xlane.xlu0 %1604 }
 0xca3   : > { %2727 = vrcp.f32 %v1605_v14  ;;  %v1608_v3 = vpop.xlane.xlu1 %1607 }
 0xca4   : > { %2729 = vrcp.f32 %v1608_v3  ;;  %v2353_v3 = vld [vmem:[%s3350_s6 + $0x1] ss:$0 sm:$0xff] }
 0xcaa   : > { %v1611_v15 = vpop.xlane.xlu0 %1610 }
 0xcab   : > { %2731 = vrcp.f32 %v1611_v15  ;;  %v1614_v16 = vpop.xlane.xlu1 %1613 }
 0xcac   : > { %2733 = vrcp.f32 %v1614_v16  ;;  %v2354_v16 = vld [vmem:[%s3351_s7 + $0x1] ss:$0 sm:$0xff] }
 0xcae   : > { %v1772_v22 = vpop.permute.xlu0 %1771 }
 0xcaf   : > { %v1723_v20 = vpop.permute.xlu1 %1722  ;;  %v1777_v13 = vsel %vm810_vm3, %v1772_v22, 0  ;;  %v2695_v22 = vld [vmem:[%s3354_s10 + $0x28] sm:$0xff]  }
 0xcb0   : > { %v2728_v17 = vpop.eup %2727  ;;  %v1728_v25 = vsel %vm810_vm3, %v1723_v20, 0  ;;  %v2693_v20 = vld [vmem:[%s3354_s10 + $0x38] sm:$0xff]  }
 0xcb1   : > { %v2730_v18 = vpop.eup %2729  ;;  %v1619_v19 = vmul.f32 %v2728_v17, %v2720_v2 }
 0xcb2   : > { %v1620_v21 = vmul.f32 %v2730_v18, %v2722_v4 }
 0xcb3   : > { %v1623_v23 = vpack.c.bf16 %v1619_v19, %v1619_v19 }
 0xcb4   : > { %v1672_v24 = vpack.c.bf16 %v1620_v21, %v1620_v21  ;;  %v2694_v21 = vld [vmem:[%s3354_s10 + $0x30] sm:$0xff]  }
 0xcb5   : > { %2568 = vmatmul.mubr.msk.bf16.vlgmr.msra.gmra.mxu0 %vm553_vm2, %v1623_v23  ;;  %v2696_v23 = vld [vmem:[%s3354_s10 + $0x20] sm:$0xff]  }
 0xcb6   : > { %2574 = vmatmul.mubr.msk.bf16.vlgmr.msra.gmra.mxu1 %vm553_vm2, %v1672_v24  ;;  %2578 = vmatpush3.bf16.msra.mxu0 %v1728_v25  ;;  %v2360_v24 = vld [vmem:[%s3353_s9 + $0x1] ss:$0 sm:$0xff] }
 0xcb7   : > { %2584 = vmatpush3.bf16.msra.mxu1 %v1777_v13  ;;  %2579 = vmatprep.mubr.msk.bf16.mxu0 %vm2807_vm0, %v2806_v1 }
 0xcb8   : > { %v2732_v26 = vpop.eup %2731  ;;  %2585 = vmatprep.mubr.msk.bf16.mxu1 %vm2807_vm0, %v2806_v1  ;;  %2589 = vmatprep.subr.bf16.mxu0 %v2806_v1 }
 0xcb9   : > { %v2734_v27 = vpop.eup %2733  ;;  %v1621_v28 = vmul.f32 %v2732_v26, %v2724_v8  ;;  %2597 = vmatprep.subr.bf16.mxu1 %v2806_v1  ;;  %v2691_v8 = vld [vmem:[%s3352_s8 + $0x18] sm:$0xff]  }
 0xcba   : > { %v1622_v9 = vmul.f32 %v2734_v27, %v2726_v10 }
 0xcbb   : > { %v1721_v30 = vpack.c.bf16 %v1621_v28, %v1621_v28 }
 0xcbc   : > { %v1770_v31 = vpack.c.bf16 %v1622_v9, %v1622_v9 }
 0xcbd   : > { %2580 = vmatmul.mubr.msk.bf16.vlgmr.msra.gmra.mxu0 %vm553_vm2, %v1721_v30 }
 0xcbe   : > { %2586 = vmatmul.mubr.msk.bf16.vlgmr.msra.gmra.mxu1 %vm553_vm2, %v1770_v31  ;;  %2593 = vmatprep.mubr.msk.bf16.mxu0 %vm2807_vm0, %v2806_v1 }
 0xcbf   : > { %2601 = vmatprep.mubr.msk.bf16.mxu1 %vm2807_vm0, %v2806_v1  ;;  %2590 = vmatpush3.bf16.msra.mxu0 %v2689_v32 }
 0xcc0   : > { %2591 = vmatprep.subr.bf16.mxu0 %v2806_v1  ;;  %2598 = vmatpush3.bf16.msra.mxu1 %v2691_v8 }
 0xcc1   : > { %2599 = vmatprep.subr.bf16.mxu1 %v2806_v1 }
 0xcc3   : > { %2592 = vmatpush3.bf16.msra.mxu0 %v2690_v33 }
 0xcc4   : > { %2605 = vmatprep.subr.bf16.mxu0 %v2806_v1 }
 0xd75   : > { %v1666_v34 = vpop.f32.mrf.mxu0 }
 0xd76   : > { %v1715_v35 = vpop.f32.mrf.mxu1 }
 0xd77   : > { %1820 = vrot.lane.b32.xlu1 %v1715_v35, %s3394_s26  ;;  %v2569_v36 = vpop.f32.mrf.mxu0 }
 0xd78   : > { %v2575_v37 = vpop.f32.mrf.mxu1 }
 0xd79   : > { %v1669_v38 = vpop.f32.mrf.mxu0 }
 0xd7a   : > { %v1718_v39 = vpop.f32.mrf.mxu1  ;;  %v2373_v38 = vld [vmem:[%s3355_s11 + $0x1] ss:$0 sm:$0xff] }
 0xd7b   : > { %v2570_v40 = vpop.f32.mrf.mxu0 }
 0xd7c   : > { %v2576_v41 = vpop.f32.mrf.mxu1 }
 0xd7d   : > { %v1764_v42 = vpop.f32.mrf.mxu0 }
 0xd7e   : > { %v1813_v43 = vpop.f32.mrf.mxu1  ;;  %1824 = vrot.lane.b32.xlu0 %v1764_v42, %s3395_s28 }
 0xd7f   : > { %1828 = vrot.lane.b32.xlu1 %v1813_v43, %s3396_s18  ;;  %v2581_v44 = vpop.f32.mrf.mxu0  ;;  %s3309_s18 = scalar_lea.hbm %s3358_s14, %s2384_s0 }
 0xd80   : > { %v2587_v45 = vpop.f32.mrf.mxu1 }
 0xd81   : > { %v1767_v46 = vpop.f32.mrf.mxu0 }
 0xd82   : > { %v1816_v47 = vpop.f32.mrf.mxu1 }
 0xd83   : > { %v2582_v48 = vpop.f32.mrf.mxu0 }
 0xd84   : > { %v2588_v49 = vpop.f32.mrf.mxu1 }
 0xde9   : > { %v1821_v50 = vpop.permute.xlu1 %1820 }
 0xdea   : > { %v1831_v29 = vsel %vm553_vm2, %v1666_v34, %v1821_v50 }
 0xdf0   : > { %v1825_v51 = vpop.permute.xlu0 %1824 }
 0xdf1   : > { %v1832_v52 = vsel %vm1014_vm4, %v1831_v29, %v1825_v51  ;;  %v1829_v53 = vpop.permute.xlu1 %1828  ;;  %v2743_v29 = vld [vmem:[%s3019_s20] sm:$0x1]  ;;  %s467_s20 = sand.u32 1, %s2796_s30  }
 0xdf2   : > { %v1833_v54 = vsel %vm1016_vm5, %v1832_v52, %v1829_v53  ;;  %v2204_v51 = vsel %vm2203_vm7, %v2743_v29, 0.0  ;;  %s468_s1 = scalar_lea.vmem [#allocation2], %s467_s20  ;;  %s2213_s25 = scalar_lea.sflag [#allocation3], %s467_s20 }
 0xdf3   : > { %v1834_v55 = vpack.c.bf16 %v1833_v54, %v1833_v54  ;;  %s2225_s21 = sshll.u32 %s468_s1, 4  ;;  %s2226_s21 = int_to_ptr.vmem [resolvable:$true] %s2225_s21 }
 0xdf4   : > { %s2744_s27 = scalar_lea.vmem %s2226_s21, 16  ;;  %p2751_p0 = scmp.lt.s32.totalorder %s2226_s21, %s2749_s2 }
 0xdf5   : > { %2594 = vmatmul.mubr.msk.bf16.vlgmr.msra.gmra.mxu0 %vm505_vm1, %v1834_v55  ;;  %p2745_p11 = scmp.ne.s32.totalorder %s2226_s21, %s2744_s27  ;;  %p2752_p1 = scmp.lt.s32.totalorder %s2750_s3, %s2744_s27 }
 0xdf6   : > { %2613 = vmatprep.mubr.msk.bf16.mxu0 %vm2807_vm0, %v2806_v1  ;;  %2606 = vmatpush3.bf16.msra.mxu0 %v2693_v20 }
 0xdf7   : > { %2607 = vmatprep.subr.bf16.mxu0 %v2806_v1  ;;  %p2746_p12 = pnand %p2745_p11, %p2936_p5  ;;  %p2753_p2 = por %p2752_p1, %p2751_p0 }
 0xdf9   : > { %p2747_p13 = pneg %p2746_p12 }
 0xdfa   : > { %2608 = vmatpush3.bf16.msra.mxu0 %v2694_v21 }
 0xdfb   : > { %2609 = vmatprep.subr.bf16.mxu0 %v2806_v1  ;;  %p2754_p3 = pnand %p2753_p2, %p2747_p13 }
 0xdfe   : > { %2610 = vmatpush3.bf16.msra.mxu0 %v2695_v22 }
 0xdff   : > { %2611 = vmatprep.subr.bf16.mxu0 %v2806_v1 }
 0xe02   : > { %2612 = vmatpush3.bf16.msra.mxu0 %v2696_v23 }
 0xeb5   : > { %v1897_v57 = vpop.f32.mrf.mxu0 }
 0xeb6   : > { %v1898_v58 = vadd.f32 %v2347_v56, %v1897_v57  ;;  %v2381_v56 = vld [vmem:[%s3356_s12 + $0x1] ss:$0 sm:$0xff] }
 0xeb7   : > { %v2595_v59 = vpop.f32.mrf.mxu0 }
 0xeb8   : > { %v1903_v60 = vadd.f32 %v1898_v58, %v3145_v6  ;;  %v2692_v6 = vld [vmem:[%s3352_s8 + $0x10] sm:$0xff]   ;;  %v2382_v58 = vld [vmem:[%s3357_s13 + $0x1] ss:$0 sm:$0xff] }
 0xeb9   : > { %v1900_v61 = vpop.f32.mrf.mxu0  ;;  %2600 = vmatpush3.bf16.msra.mxu1 %v2692_v6 }
 0xeba   : > { %v1908_v62 = vsel %vm505_vm1, %v1903_v60, 0.0  ;;  %2617 = vmatprep.subr.mxu1 %v2806_v1 }
 0xebb   : > { %1909 = vadd.xlane.f32.xlu0 %v1908_v62  ;;  %v2596_v63 = vpop.f32.mrf.mxu0 }
 0xf44   : > { %v1910_v0 = vpop.xlane.xlu0 %1909 }
 0xf45   : > { %v1911_v2 = vmul.f32 0.03125, %v1910_v0 }
 0xf47   : > { %v1912_v4 = vsub.f32 %v1903_v60, %v1911_v2 }
 0xf49   : > { %v1913_v5 = vmul.f32 %v1912_v4, %v1912_v4 }
 0xf4b   : > { %v1914_v7 = vsel %vm505_vm1, %v1913_v5, 0.0 }
 0xf4c   : > { %1915 = vadd.xlane.f32.xlu1 %v1914_v7 }
 0xf50   : > { %2205 = vadd.xlane.f32.xlu1 %v2204_v51 }
 0xfd5   : > { %v1916_v10 = vpop.xlane.xlu1 %1915 }
 0xfd6   : > { %v1917_v11 = vmul.f32 0.03125, %v1916_v10 }
 0xfd8   : > { %v1918_v12 = vadd.f32 1e-12, %v1917_v11 }
 0xfd9   : > { %v2206_v61 = vpop.xlane.xlu1 %2205 }
 0xfda   : > { %2735 = vrsqrt.f32 %v1918_v12  ;;  %v2207_v62 = vmax.f32 %v2206_v61, 1e-09 }
 0xfe7   : > { %v2736_v14 = vpop.eup %2735 }
 0xfe8   : > { %v1920_v15 = vmul.f32 %v2736_v14, %v1912_v4 }
 0xfea   : > { %v1927_v17 = vmul.f32 %v2353_v3, %v1920_v15 }
 0xfec   : > { %v1934_v18 = vadd.f32 %v2354_v16, %v1927_v17 }
 0xfee   : > { %v1935_v19 = vpack.c.bf16 %v1934_v18, %v1934_v18 }
 0xff0   : > { %2602 = vmatmul.mubr.msk.bf16.vlgmr.msra.gmra.mxu1 %vm505_vm1, %v1935_v19 }
 0xff1   : > { %2619 = vmatprep.mubr.msk.f32.mxu1 %vm2807_vm0, %v2806_v1 }
0x10b0   : > { %v1998_v25 = vpop.f32.mrf.mxu1 }
0x10b1   : > { %v1999_v13 = vadd.f32 %v2360_v24, %v1998_v25 }
0x10b2   : > { %v2603_v26 = vpop.f32.mrf.mxu1 }
0x10b3   : > { %v2005_v27 = vmul.f32 0.044715, %v1999_v13  ;;  %v2004_v35 = vmul.f32 0.5, %v1999_v13 }
0x10b4   : > { %v2001_v28 = vpop.f32.mrf.mxu1 }
0x10b5   : > { %v2006_v9 = vmul.f32 %v2005_v27, %v1999_v13 }
0x10b6   : > { %v2604_v30 = vpop.f32.mrf.mxu1 }
0x10b7   : > { %v2007_v31 = vmul.f32 %v2006_v9, %v1999_v13 }
0x10b9   : > { %v2008_v32 = vadd.f32 %v2007_v31, %v1999_v13 }
0x10bb   : > { %v2009_v33 = vmul.f32 0.7978846, %v2008_v32 }
0x10bd   : > { %2737 = vtanh.f32 %v2009_v33 }
0x10ca   : > { %v2738_v34 = vpop.eup %2737 }
0x10cb   : > { %v2011_v36 = vadd.f32 1.0, %v2738_v34 }
0x10cd   : > { %v2012_v1 = vmul.f32 %v2011_v36, %v2004_v35 }
0x10cf   : > { %v2013_v37 = vpack.c.bf16 %v2012_v1, %v2012_v1 }
0x10d1   : > { %2614 = vmatmul.mubr.msk.bf16.vlgmr.msra.gmra.mxu0 %vm1232_vm6, %v2013_v37 }
0x1191   : > { %v2092_v39 = vpop.f32.mrf.mxu0 }
0x1192   : > { %v2093_v40 = vadd.f32 %v2373_v38, %v2092_v39 }
0x1193   : > { %v2615_v41 = vpop.f32.mrf.mxu0 }
0x1194   : > { %v2098_v42 = vadd.f32 %v2093_v40, %v1934_v18 }
0x1195   : > { %v2095_v43 = vpop.f32.mrf.mxu0 }
0x1196   : > { %v2103_v44 = vsel %vm505_vm1, %v2098_v42, 0.0 }
0x1197   : > { %2104 = vadd.xlane.f32.xlu0 %v2103_v44  ;;  %v2616_v45 = vpop.f32.mrf.mxu0 }
0x1220   : > { %v2105_v46 = vpop.xlane.xlu0 %2104 }
0x1221   : > { %v2106_v47 = vmul.f32 0.03125, %v2105_v46 }
0x1223   : > { %v2107_v48 = vsub.f32 %v2098_v42, %v2106_v47 }
0x1225   : > { %v2108_v49 = vmul.f32 %v2107_v48, %v2107_v48 }
0x1227   : > { %v2109_v50 = vsel %vm505_vm1, %v2108_v49, 0.0 }
0x1228   : > { %2110 = vadd.xlane.f32.xlu0 %v2109_v50 }
0x12b1   : > { %v2111_v52 = vpop.xlane.xlu0 %2110 }
0x12b2   : > { %v2112_v53 = vmul.f32 0.03125, %v2111_v52 }
0x12b4   : > { %v2113_v54 = vadd.f32 1e-12, %v2112_v53 }
0x12b6   : > { %2739 = vrsqrt.f32 %v2113_v54 }
0x12b7   : > { %2741 = vrcp.f32 %v2207_v62 }
0x12c3   : > { %v2740_v55 = vpop.eup %2739 }
0x12c4   : > { %v2115_v57 = vmul.f32 %v2740_v55, %v2107_v48  ;;  %v2742_v63 = vpop.eup %2741 }
0x12c6   : > { %v2122_v59 = vmul.f32 %v2381_v56, %v2115_v57 }
0x12c8   : > { %v2129_v60 = vadd.f32 %v2382_v58, %v2122_v59 }
0x12ca   : > { %2618 = vmatpush3.msra.mxu1 %v2129_v60 }
0x12cb   : > { %2620 = vmatmul.mubr.msk.f32.vlgmr.msra.gmra.mxu1 %vm553_vm2, %v2743_v29 }
0x138b   : > { %v2199_v0 = vpop.f32.mrf.mxu1 }
0x138c   : > { %v2209_v2 = vmul.f32 %v2742_v63, %v2199_v0 }
0x138d   : > { %v2621_v4 = vpop.f32.mrf.mxu1 }
0x138e   : > { %2211 = vst.msk [vmem:[%s468_s1] sm:$0x1] %vm2210_vm8, %v2209_v2 }
0x138f   : > { %2757 = shalt.err (!%p2754_p3)
}
0x1390   : > { %s2758_s0 = scalar_lea.hbm %s3309_s18, 16  ;;  %s2762_s26 = scalar_lea.hbm %s3358_s14, 32 }
0x1391   : > { %p2759_p4 = scmp.ne.s32.totalorder %s3309_s18, %s2758_s0  ;;  %p2763_p9 = scmp.lt.s32.totalorder %s3309_s18, %s3358_s14 }
0x1392   : > { %p2764_p10 = scmp.lt.s32.totalorder %s2762_s26, %s2758_s0 }
0x1393   : > { %p2760_p7 = pnand %p2759_p4, %p2936_p5 }
0x1394   : > { %p2765_p11 = por %p2764_p10, %p2763_p9 }
0x1395   : > { %p2761_p8 = pneg %p2760_p7 }
0x1397   : > { %p2766_p12 = pnand %p2765_p11, %p2761_p8 }
0x1399   : > { %2769 = shalt.err (!%p2766_p12)
}
0x139a   : > { %2622 = dma.vmem_to_hbm [thread:$0]  (%p2936_p5), %s2226_s21, 16, %s3309_s18, %s2213_s25  }
0x139b PF: > { %p2628_p13 = scmp.ge.s32.totalorder %s2804_s16, 2  ;;  %s2237_s2 = sand.u32 1, %s2792_s29  }
0x139c   : > { %s2238_s3 = scalar_lea.sflag [#allocation3], %s2237_s2 }
0x139d   : > { %p2625_p0 = pnand %p2628_p13, %p2940_p6 }
0x139f   : > { %p2626_p1 = pneg %p2625_p0 }
0x13a1   : > { %2787 = dma.done.wait (%p2626_p1), %s2238_s3, 16  }
0x13a2   : > { %2789 = vsyncadd (%p2626_p1), %s2238_s3, 4294967280  ;;  %p24_p2 = scmp.ge.s32.totalorder %s2923_s19, 4   ;;  %s3397_s29 = smov %s2796_s30 }
0x13a3   : > { %s3398_s30 = smov %s2800_s15  ;;  %s3399_s15 = smov %s2934_s22 }
0x13a4   : > { %s3400_s16 = smov %s2923_s19  ;;  %26 = sbr.rel (!%p24_p2) target bundleno = 8 (0x8), region = 126 }
0x13a9   :  { %2242 = vsyncpa [#allocation3], 1 }
0x13aa   :  { %2244 = vsyncpa [#allocation3 + $0x1], 1 }

</bundles_post_ra>
